<compile_context>
chip_gen: v7x
topology: tpu7x:2x2x1
jax: 0.10.0
libtpu: 0.0.40
codegen_flags: <defaults>
</compile_context>

<pallas_src>
import functools

import jax
import jax.numpy as jnp
from jax.experimental import pallas as pl
from jax.experimental.pallas import tpu as pltpu


def _round_up(x, m):
    return ((x + m - 1) // m) * m


# ----------------------------- in-kernel helpers -----------------------------

def _layernorm(x, w, b, eps=1e-5):
    mu = jnp.mean(x, axis=-1, keepdims=True)
    var = jnp.mean((x - mu) ** 2, axis=-1, keepdims=True)
    return (x - mu) * jax.lax.rsqrt(var + eps) * w + b


# ----------------------------- fused kernel body ------------------------------
# Packed parameter-vector slab row layout (must match wrapper):
#  0 ln1_w  1 ln1_b  2 embed_b  3 ln2_w  4 ln2_b  5 ln_a_w  6 ln_a_b  7 bo
#  8 ln_f_w 9 ln_f_b 10 b1     11 b2    12 ln_h_w 13 ln_h_b 14 head_b

def vit_fused_kernel(x_ref, gate_ref, clspos_ref, vecs_ref, pool_ref,
                     ew_ref, wqkv_ref, wo_ref, w1_ref, w2_ref, hw_ref,
                     out_ref,
                     *, batch, s_pad, dim, num_heads, head_dim,
                     n_patches, patch_dim, mlp_pad, c_pad):
    f32, bf16 = jnp.float32, jnp.bfloat16
    n_tok = n_patches + 1
    rows = batch * s_pad
    scale = 1.0 / (head_dim ** 0.5)

    # ---- unpack the coalesced parameter-vector slab (one DMA for ~15 params)
    vecs = vecs_ref[...]
    ln1w, ln1b = vecs[0:1, :patch_dim], vecs[1:2, :patch_dim]
    eb = vecs[2:3, :dim]
    ln2w, ln2b = vecs[3:4, :dim], vecs[4:5, :dim]
    lnaw, lnab = vecs[5:6, :dim], vecs[6:7, :dim]
    bo = vecs[7:8, :dim]
    lnfw, lnfb = vecs[8:9, :dim], vecs[9:10, :dim]
    b1 = vecs[10:11, :mlp_pad]
    b2 = vecs[11:12, :dim]
    lnhw, lnhb = vecs[12:13, :dim], vecs[13:14, :dim]
    hb = vecs[14:15, :c_pad]

    # ---- patch embedding: LayerNorm -> Linear -> LayerNorm (B folded in rows)
    x = x_ref[...]                                            # (rows, patch_dim) f32
    xn = _layernorm(x, ln1w, ln1b)
    h = jnp.dot(xn.astype(bf16), ew_ref[...], preferred_element_type=f32) + eb
    h = _layernorm(h, ln2w, ln2b)                             # (rows, dim)

    # zero the cls slot / padded rows, then add cls token + positional embedding
    tokens = h * gate_ref[...] + clspos_ref[...]              # (rows, dim)

    # ---- multi-head self-attention (pre-norm), fused lane-dense QKV matmul ----
    xa = _layernorm(tokens, lnaw, lnab).astype(bf16)
    qkv = jnp.dot(xa, wqkv_ref[...], preferred_element_type=f32)   # (rows, 128) f32
    qkv3 = qkv.reshape(batch, s_pad, qkv.shape[-1])           # leading-dim split only

    kidx = jax.lax.broadcasted_iota(jnp.int32, (1, s_pad), 1)
    kmask = kidx < n_tok                                      # mask padded keys

    o_heads = []
    for hh in range(num_heads):
        lo = hh * head_dim
        q_h = (qkv3[:, :, lo:lo + head_dim] * scale).astype(bf16)          # (B,S,hd)
        k_h = qkv3[:, :, dim + lo:dim + lo + head_dim].astype(bf16)
        v_h = qkv3[:, :, 2 * dim + lo:2 * dim + lo + head_dim].astype(bf16)
        s = jnp.einsum('bqe,bke->bqk', q_h, k_h,
                       preferred_element_type=f32)                        # (B,S,S)
        s = jnp.where(kmask, s, -1e30)
        s = s - jnp.max(s, axis=-1, keepdims=True)
        p = jnp.exp(s)
        p = p * pl.reciprocal(jnp.sum(p, axis=-1, keepdims=True), approx=True)
        o_heads.append(jnp.einsum('bqk,bke->bqe', p.astype(bf16), v_h,
                                  preferred_element_type=f32))            # (B,S,hd)

    o = jnp.concatenate(o_heads, axis=-1).reshape(rows, dim)  # merge heads -> (rows,D)
    attn = jnp.dot(o.astype(bf16), wo_ref[...], preferred_element_type=f32) + bo
    x1 = tokens + attn                                        # residual

    # ---- feed-forward (pre-norm); mlp dim zero-padded to 128 lanes (exact) ----
    xf = _layernorm(x1, lnfw, lnfb).astype(bf16)
    hid = jnp.dot(xf, w1_ref[...], preferred_element_type=f32) + b1
    # TODO(synk): vit_pytorch's FeedForward uses exact-erf nn.GELU(); tanh
    # approximation used here (cheaper on v5e VPU/EUP, tiny numerical delta).
    hid = jax.nn.gelu(hid)
    ff = jnp.dot(hid.astype(bf16), w2_ref[...], preferred_element_type=f32) + b2
    x2 = x1 + ff                                              # (rows, dim)

    # ---- pool (cls-select or masked mean, one tiny exact f32 matmul) -> LN -> head
    pooled = jnp.dot(pool_ref[...], x2, preferred_element_type=f32)   # (B, dim)
    pn = _layernorm(pooled, lnhw, lnhb).astype(bf16)
    logits = jnp.dot(pn, hw_ref[...], preferred_element_type=f32) + hb
    out_ref[...] = logits.astype(out_ref.dtype)               # (B, c_pad)


# ----------------------------- wrapper ----------------------------------------

def vit_forward(img, params, *, patch_size, num_heads, pool='cls'):
    assert pool in ('cls', 'mean')
    B, C, H_img, W_img = img.shape
    p = patch_size
    hp, wp = H_img // p, W_img // p
    n = hp * wp
    patch_dim = C * p * p
    dim = params['embed_w'].shape[1]
    mlp_dim = params['w1'].shape[1]
    num_classes = params['head_w'].shape[1]
    head_dim = dim // num_heads
    n_tok = n + 1
    s_pad = _round_up(n_tok, 8)                 # pad sequence to sublane multiple
    rows = B * s_pad
    qkv_pad = _round_up(3 * dim, 128)           # lane-dense fused QKV output
    mlp_pad = _round_up(mlp_dim, 128)           # lane-dense MLP hidden
    c_pad = _round_up(num_classes, 128)         # lane-dense logits
    vec_len = max(_round_up(patch_dim, 128), mlp_pad, c_pad, 128)
    n_vec_rows = _round_up(15, 8)
    f32, bf16 = jnp.float32, jnp.bfloat16

    # einops 'b c (h p1) (w p2) -> b (h w) (p1 p2 c)' + zero cls slot / pad rows,
    # with batch folded into the row axis: (B*s_pad, patch_dim)
    patches = (img.reshape(B, C, hp, p, wp, p)
                  .transpose(0, 2, 4, 3, 5, 1)
                  .reshape(B, n, patch_dim)).astype(f32)
    x = jnp.zeros((B, s_pad, patch_dim), f32).at[:, 1:n_tok, :].set(patches)
    x = x.reshape(rows, patch_dim)

    # row gate: 1.0 on patch rows (zeroes embedded garbage on cls slot / pad rows)
    gate = jnp.zeros((B, s_pad, 1), f32).at[:, 1:n_tok, :].set(1.0).reshape(rows, 1)

    # cls token + positional embedding per row (zero on pad rows), tiled over B
    cls_pos = jnp.zeros((s_pad, dim), f32)
    cls_pos = cls_pos.at[0, :].set(params['cls'][0, 0] + params['pos'][0, 0])
    cls_pos = cls_pos.at[1:n_tok, :].set(params['pos'][0, 1:n_tok])
    cls_pos = jnp.broadcast_to(cls_pos[None], (B, s_pad, dim)).reshape(rows, dim)

    # pooling matrix: per-batch cls-row selection or masked mean pooling
    pm = jnp.zeros((B, s_pad), f32)
    if pool == 'mean':
        pm = pm.at[:, :n_tok].set(1.0 / n_tok)
    else:
        pm = pm.at[:, 0].set(1.0)
    pool_mat = (jnp.eye(B, dtype=f32)[:, :, None] * pm[:, None, :]).reshape(B, rows)

    # coalesced 1-D parameter vectors (one DMA instead of ~15 tiny ones)
    vec_rows = [
        params['ln1_w'], params['ln1_b'],
        params['embed_b'],
        params['ln2_w'], params['ln2_b'],
        params['ln_a_w'], params['ln_a_b'],
        params['bo'],
        params['ln_f_w'], params['ln_f_b'],
        params['b1'],
        params['b2'],
        params['ln_h_w'], params['ln_h_b'],
        params['head_b'],
    ]
    vecs = jnp.zeros((n_vec_rows, vec_len), f32)
    for i, r in enumerate(vec_rows):
        r = jnp.ravel(r).astype(f32)
        vecs = vecs.at[i, :r.shape[0]].set(r)

    # lane-dense bf16 matmul weights (padding columns/rows are zero -> exact)
    ew = params['embed_w'].astype(bf16)                              # (patch_dim, D)
    wqkv = jnp.zeros((dim, qkv_pad), f32)
    wqkv = wqkv.at[:, 0:dim].set(params['wq'])
    wqkv = wqkv.at[:, dim:2 * dim].set(params['wk'])
    wqkv = wqkv.at[:, 2 * dim:3 * dim].set(params['wv'])
    wqkv = wqkv.astype(bf16)                                         # (D, 128)
    wo = params['wo'].astype(bf16)                                   # (D, D)
    w1 = jnp.zeros((dim, mlp_pad), f32).at[:, :mlp_dim].set(params['w1']).astype(bf16)
    w2 = jnp.zeros((mlp_pad, dim), f32).at[:mlp_dim, :].set(params['w2']).astype(bf16)
    hw = jnp.zeros((dim, c_pad), f32).at[:, :num_classes].set(
        params['head_w']).astype(bf16)

    kernel = functools.partial(
        vit_fused_kernel, batch=B, s_pad=s_pad, dim=dim, num_heads=num_heads,
        head_dim=head_dim, n_patches=n, patch_dim=patch_dim,
        mlp_pad=mlp_pad, c_pad=c_pad)

    args = (x, gate, cls_pos, vecs, pool_mat, ew, wqkv, wo, w1, w2, hw)

    def full_spec(a):
        nd = a.ndim
        return pl.BlockSpec(a.shape, lambda i, nd=nd: (0,) * nd)

    # Single fused grid step: batch is folded into the matmul M dimension.
    # TODO(synk): on v7x (2 TCs) a 2-way "parallel" batch split only pays off
    # once per-core work exceeds the ~600-cycle step overhead; not at these shapes.
    logits_pad = pl.pallas_call(
        kernel,
        out_shape=jax.ShapeDtypeStruct((B, c_pad), f32),
        grid=(1,),
        in_specs=[full_spec(a) for a in args],
        out_specs=pl.BlockSpec((B, c_pad), lambda i: (0, 0)),
        compiler_params=pltpu.CompilerParams(
            dimension_semantics=("arbitrary",)),
    )(*args)

    return logits_pad[:, :num_classes]


# ----------------------------- parameter init ---------------------------------

def init_params(key, *, patch_dim, dim, mlp_dim, num_classes, num_patches):
    ks = jax.random.split(key, 10)

    def nrm(k, shape, scale=0.02):
        return (scale * jax.random.normal(k, shape)).astype(jnp.float32)

    ones = lambda n: jnp.ones((1, n), jnp.float32)
    zeros = lambda n: jnp.zeros((1, n), jnp.float32)

    return dict(
        # patch embedding
        ln1_w=ones(patch_dim), ln1_b=zeros(patch_dim),
        embed_w=nrm(ks[0], (patch_dim, dim)), embed_b=zeros(dim),
        ln2_w=ones(dim), ln2_b=zeros(dim),
        cls=nrm(ks[1], (1, 1, dim), 1.0),
        pos=nrm(ks[2], (1, num_patches + 1, dim), 1.0),
        # transformer block
        ln_a_w=ones(dim), ln_a_b=zeros(dim),
        wq=nrm(ks[3], (dim, dim)), wk=nrm(ks[4], (dim, dim)),
        wv=nrm(ks[5], (dim, dim)),
        wo=nrm(ks[6], (dim, dim)), bo=zeros(dim),
        ln_f_w=ones(dim), ln_f_b=zeros(dim),
        w1=nrm(ks[7], (dim, mlp_dim)), b1=zeros(mlp_dim),
        w2=nrm(ks[8], (mlp_dim, dim)), b2=zeros(dim),
        # mlp head
        ln_h_w=ones(dim), ln_h_b=zeros(dim),
        head_w=nrm(ks[9], (dim, num_classes)), head_b=zeros(num_classes),
    )


# ----------------------------- main -------------------------------------------

if __name__ == "__main__":
    # small, module-consistent shapes
    B, C, IMG, PATCH = 2, 4, 16, 4
    DIM, MLP_DIM, HEADS, NUM_CLASSES = 32, 64, 4, 8
    N_PATCHES = (IMG // PATCH) ** 2            # 16
    PATCH_DIM = C * PATCH * PATCH              # 64

    key = jax.random.PRNGKey(0)
    k_img, k_par = jax.random.split(key)
    img = jax.random.normal(k_img, (B, C, IMG, IMG), dtype=jnp.float32)

    params = init_params(k_par, patch_dim=PATCH_DIM, dim=DIM, mlp_dim=MLP_DIM,
                         num_classes=NUM_CLASSES, num_patches=N_PATCHES)

    logits = vit_forward(img, params, patch_size=PATCH,
                         num_heads=HEADS, pool='cls')
    logits = jax.block_until_ready(logits)
    assert logits.shape == (B, NUM_CLASSES)
    print("KERNEL_OK")
</pallas_src>

<mosaic_0001>
module attributes {stable_mosaic.version = 11 : i64} {
  func.func @vit_fused_kernel(%arg0: i32, %arg1: memref<48x64xf32, #tpu.memory_space<vmem>>, %arg2: memref<48x1xf32, #tpu.memory_space<vmem>>, %arg3: memref<48x32xf32, #tpu.memory_space<vmem>>, %arg4: memref<16x128xf32, #tpu.memory_space<vmem>>, %arg5: memref<2x48xf32, #tpu.memory_space<vmem>>, %arg6: memref<64x32xbf16, #tpu.memory_space<vmem>>, %arg7: memref<32x128xbf16, #tpu.memory_space<vmem>>, %arg8: memref<32x32xbf16, #tpu.memory_space<vmem>>, %arg9: memref<32x128xbf16, #tpu.memory_space<vmem>>, %arg10: memref<128x32xbf16, #tpu.memory_space<vmem>>, %arg11: memref<32x128xbf16, #tpu.memory_space<vmem>>, %arg12: memref<2x128xf32, #tpu.memory_space<vmem>>) attributes {dimension_semantics = [#tpu.dimension_semantics<arbitrary>], iteration_bounds = array<i64: 1>, scalar_prefetch = 0 : i64, scratch_operands = 0 : i64, tpu.core_type = #tpu.core_type<tc>, window_params = [{pipeline_mode = #tpu.pipeline_mode<synchronous>, transform_indices = @transform_0, window_bounds = array<i64: 48, 64>}, {pipeline_mode = #tpu.pipeline_mode<synchronous>, transform_indices = @transform_1, window_bounds = array<i64: 48, 1>}, {pipeline_mode = #tpu.pipeline_mode<synchronous>, transform_indices = @transform_2, window_bounds = array<i64: 48, 32>}, {pipeline_mode = #tpu.pipeline_mode<synchronous>, transform_indices = @transform_3, window_bounds = array<i64: 16, 128>}, {pipeline_mode = #tpu.pipeline_mode<synchronous>, transform_indices = @transform_4, window_bounds = array<i64: 2, 48>}, {pipeline_mode = #tpu.pipeline_mode<synchronous>, transform_indices = @transform_5, window_bounds = array<i64: 64, 32>}, {pipeline_mode = #tpu.pipeline_mode<synchronous>, transform_indices = @transform_6, window_bounds = array<i64: 32, 128>}, {pipeline_mode = #tpu.pipeline_mode<synchronous>, transform_indices = @transform_7, window_bounds = array<i64: 32, 32>}, {pipeline_mode = #tpu.pipeline_mode<synchronous>, transform_indices = @transform_8, window_bounds = array<i64: 32, 128>}, {pipeline_mode = #tpu.pipeline_mode<synchronous>, transform_indices = @transform_9, window_bounds = array<i64: 128, 32>}, {pipeline_mode = #tpu.pipeline_mode<synchronous>, transform_indices = @transform_10, window_bounds = array<i64: 32, 128>}, {pipeline_mode = #tpu.pipeline_mode<synchronous>, transform_indices = @transform_11, window_bounds = array<i64: 2, 128>}]} {
    %c0 = arith.constant 0 : index
    %c0_0 = arith.constant 0 : index
    %0 = vector.load %arg4[%c0, %c0_0] : memref<16x128xf32, #tpu.memory_space<vmem>>, vector<16x128xf32>
    %1 = vector.extract_strided_slice %0 {offsets = [0, 0], sizes = [1, 64], strides = [1, 1]} : vector<16x128xf32> to vector<1x64xf32>
    %2 = vector.extract_strided_slice %0 {offsets = [1, 0], sizes = [1, 64], strides = [1, 1]} : vector<16x128xf32> to vector<1x64xf32>
    %3 = vector.extract_strided_slice %0 {offsets = [2, 0], sizes = [1, 32], strides = [1, 1]} : vector<16x128xf32> to vector<1x32xf32>
    %4 = vector.extract_strided_slice %0 {offsets = [3, 0], sizes = [1, 32], strides = [1, 1]} : vector<16x128xf32> to vector<1x32xf32>
    %5 = vector.extract_strided_slice %0 {offsets = [4, 0], sizes = [1, 32], strides = [1, 1]} : vector<16x128xf32> to vector<1x32xf32>
    %6 = vector.extract_strided_slice %0 {offsets = [5, 0], sizes = [1, 32], strides = [1, 1]} : vector<16x128xf32> to vector<1x32xf32>
    %7 = vector.extract_strided_slice %0 {offsets = [6, 0], sizes = [1, 32], strides = [1, 1]} : vector<16x128xf32> to vector<1x32xf32>
    %8 = vector.extract_strided_slice %0 {offsets = [7, 0], sizes = [1, 32], strides = [1, 1]} : vector<16x128xf32> to vector<1x32xf32>
    %9 = vector.extract_strided_slice %0 {offsets = [8, 0], sizes = [1, 32], strides = [1, 1]} : vector<16x128xf32> to vector<1x32xf32>
    %10 = vector.extract_strided_slice %0 {offsets = [9, 0], sizes = [1, 32], strides = [1, 1]} : vector<16x128xf32> to vector<1x32xf32>
    %11 = vector.extract_strided_slice %0 {offsets = [10, 0], sizes = [1, 128], strides = [1, 1]} : vector<16x128xf32> to vector<1x128xf32>
    %12 = vector.extract_strided_slice %0 {offsets = [11, 0], sizes = [1, 32], strides = [1, 1]} : vector<16x128xf32> to vector<1x32xf32>
    %13 = vector.extract_strided_slice %0 {offsets = [12, 0], sizes = [1, 32], strides = [1, 1]} : vector<16x128xf32> to vector<1x32xf32>
    %14 = vector.extract_strided_slice %0 {offsets = [13, 0], sizes = [1, 32], strides = [1, 1]} : vector<16x128xf32> to vector<1x32xf32>
    %15 = vector.extract_strided_slice %0 {offsets = [14, 0], sizes = [1, 128], strides = [1, 1]} : vector<16x128xf32> to vector<1x128xf32>
    %c0_1 = arith.constant 0 : index
    %c0_2 = arith.constant 0 : index
    %16 = vector.load %arg1[%c0_1, %c0_2] : memref<48x64xf32, #tpu.memory_space<vmem>>, vector<48x64xf32>
    %cst = arith.constant dense<0.000000e+00> : vector<48xf32>
    %17 = vector.multi_reduction <add>, %16, %cst [1] : vector<48x64xf32> to vector<48xf32>
    %18 = vector.shape_cast %17 : vector<48xf32> to vector<48x1xf32>
    %cst_3 = arith.constant 6.400000e+01 : f32
    %19 = vector.broadcast %cst_3 : f32 to vector<48x1xf32>
    %20 = arith.divf %18, %19 : vector<48x1xf32>
    %21 = vector.broadcast %20 : vector<48x1xf32> to vector<48x64xf32>
    %22 = arith.subf %16, %21 : vector<48x64xf32>
    %23 = arith.mulf %22, %22 : vector<48x64xf32>
    %cst_4 = arith.constant dense<0.000000e+00> : vector<48xf32>
    %24 = vector.multi_reduction <add>, %23, %cst_4 [1] : vector<48x64xf32> to vector<48xf32>
    %25 = vector.shape_cast %24 : vector<48xf32> to vector<48x1xf32>
    %cst_5 = arith.constant 6.400000e+01 : f32
    %26 = vector.broadcast %cst_5 : f32 to vector<48x1xf32>
    %27 = arith.divf %25, %26 : vector<48x1xf32>
    %28 = vector.broadcast %20 : vector<48x1xf32> to vector<48x64xf32>
    %29 = arith.subf %16, %28 : vector<48x64xf32>
    %cst_6 = arith.constant 9.99999974E-6 : f32
    %30 = vector.broadcast %cst_6 : f32 to vector<48x1xf32>
    %31 = arith.addf %27, %30 : vector<48x1xf32>
    %32 = math.rsqrt %31 : vector<48x1xf32>
    %33 = vector.broadcast %32 : vector<48x1xf32> to vector<48x64xf32>
    %34 = arith.mulf %29, %33 : vector<48x64xf32>
    %35 = vector.broadcast %1 : vector<1x64xf32> to vector<48x64xf32>
    %36 = arith.mulf %34, %35 : vector<48x64xf32>
    %37 = vector.broadcast %2 : vector<1x64xf32> to vector<48x64xf32>
    %38 = arith.addf %36, %37 : vector<48x64xf32>
    %39 = arith.truncf %38 : vector<48x64xf32> to vector<48x64xbf16>
    %c0_7 = arith.constant 0 : index
    %c0_8 = arith.constant 0 : index
    %40 = vector.load %arg6[%c0_7, %c0_8] : memref<64x32xbf16, #tpu.memory_space<vmem>>, vector<64x32xbf16>
    %cst_9 = arith.constant dense<0.000000e+00> : vector<48x32xf32>
    %41 = tpu.matmul %39, %40, %cst_9 {dimension_numbers = #tpu.dot_dimension_numbers<[1], [0], [0], [1], [0, 0, 1, 1], [], []>} : vector<48x64xbf16>, vector<64x32xbf16>, vector<48x32xf32> -> vector<48x32xf32>
    %42 = vector.broadcast %3 : vector<1x32xf32> to vector<48x32xf32>
    %43 = arith.addf %41, %42 : vector<48x32xf32>
    %cst_10 = arith.constant dense<0.000000e+00> : vector<48xf32>
    %44 = vector.multi_reduction <add>, %43, %cst_10 [1] : vector<48x32xf32> to vector<48xf32>
    %45 = vector.shape_cast %44 : vector<48xf32> to vector<48x1xf32>
    %cst_11 = arith.constant 3.200000e+01 : f32
    %46 = vector.broadcast %cst_11 : f32 to vector<48x1xf32>
    %47 = arith.divf %45, %46 : vector<48x1xf32>
    %48 = vector.broadcast %47 : vector<48x1xf32> to vector<48x32xf32>
    %49 = arith.subf %43, %48 : vector<48x32xf32>
    %50 = arith.mulf %49, %49 : vector<48x32xf32>
    %cst_12 = arith.constant dense<0.000000e+00> : vector<48xf32>
    %51 = vector.multi_reduction <add>, %50, %cst_12 [1] : vector<48x32xf32> to vector<48xf32>
    %52 = vector.shape_cast %51 : vector<48xf32> to vector<48x1xf32>
    %cst_13 = arith.constant 3.200000e+01 : f32
    %53 = vector.broadcast %cst_13 : f32 to vector<48x1xf32>
    %54 = arith.divf %52, %53 : vector<48x1xf32>
    %55 = vector.broadcast %47 : vector<48x1xf32> to vector<48x32xf32>
    %56 = arith.subf %43, %55 : vector<48x32xf32>
    %cst_14 = arith.constant 9.99999974E-6 : f32
    %57 = vector.broadcast %cst_14 : f32 to vector<48x1xf32>
    %58 = arith.addf %54, %57 : vector<48x1xf32>
    %59 = math.rsqrt %58 : vector<48x1xf32>
    %60 = vector.broadcast %59 : vector<48x1xf32> to vector<48x32xf32>
    %61 = arith.mulf %56, %60 : vector<48x32xf32>
    %62 = vector.broadcast %4 : vector<1x32xf32> to vector<48x32xf32>
    %63 = arith.mulf %61, %62 : vector<48x32xf32>
    %64 = vector.broadcast %5 : vector<1x32xf32> to vector<48x32xf32>
    %65 = arith.addf %63, %64 : vector<48x32xf32>
    %c0_15 = arith.constant 0 : index
    %c0_16 = arith.constant 0 : index
    %66 = vector.load %arg2[%c0_15, %c0_16] : memref<48x1xf32, #tpu.memory_space<vmem>>, vector<48x1xf32>
    %67 = vector.broadcast %66 : vector<48x1xf32> to vector<48x32xf32>
    %68 = arith.mulf %65, %67 : vector<48x32xf32>
    %c0_17 = arith.constant 0 : index
    %c0_18 = arith.constant 0 : index
    %69 = vector.load %arg3[%c0_17, %c0_18] : memref<48x32xf32, #tpu.memory_space<vmem>>, vector<48x32xf32>
    %70 = arith.addf %68, %69 : vector<48x32xf32>
    %cst_19 = arith.constant dense<0.000000e+00> : vector<48xf32>
    %71 = vector.multi_reduction <add>, %70, %cst_19 [1] : vector<48x32xf32> to vector<48xf32>
    %72 = vector.shape_cast %71 : vector<48xf32> to vector<48x1xf32>
    %cst_20 = arith.constant 3.200000e+01 : f32
    %73 = vector.broadcast %cst_20 : f32 to vector<48x1xf32>
    %74 = arith.divf %72, %73 : vector<48x1xf32>
    %75 = vector.broadcast %74 : vector<48x1xf32> to vector<48x32xf32>
    %76 = arith.subf %70, %75 : vector<48x32xf32>
    %77 = arith.mulf %76, %76 : vector<48x32xf32>
    %cst_21 = arith.constant dense<0.000000e+00> : vector<48xf32>
    %78 = vector.multi_reduction <add>, %77, %cst_21 [1] : vector<48x32xf32> to vector<48xf32>
    %79 = vector.shape_cast %78 : vector<48xf32> to vector<48x1xf32>
    %cst_22 = arith.constant 3.200000e+01 : f32
    %80 = vector.broadcast %cst_22 : f32 to vector<48x1xf32>
    %81 = arith.divf %79, %80 : vector<48x1xf32>
    %82 = vector.broadcast %74 : vector<48x1xf32> to vector<48x32xf32>
    %83 = arith.subf %70, %82 : vector<48x32xf32>
    %cst_23 = arith.constant 9.99999974E-6 : f32
    %84 = vector.broadcast %cst_23 : f32 to vector<48x1xf32>
    %85 = arith.addf %81, %84 : vector<48x1xf32>
    %86 = math.rsqrt %85 : vector<48x1xf32>
    %87 = vector.broadcast %86 : vector<48x1xf32> to vector<48x32xf32>
    %88 = arith.mulf %83, %87 : vector<48x32xf32>
    %89 = vector.broadcast %6 : vector<1x32xf32> to vector<48x32xf32>
    %90 = arith.mulf %88, %89 : vector<48x32xf32>
    %91 = vector.broadcast %7 : vector<1x32xf32> to vector<48x32xf32>
    %92 = arith.addf %90, %91 : vector<48x32xf32>
    %93 = arith.truncf %92 : vector<48x32xf32> to vector<48x32xbf16>
    %c0_24 = arith.constant 0 : index
    %c0_25 = arith.constant 0 : index
    %94 = vector.load %arg7[%c0_24, %c0_25] : memref<32x128xbf16, #tpu.memory_space<vmem>>, vector<32x128xbf16>
    %cst_26 = arith.constant dense<0.000000e+00> : vector<48x128xf32>
    %95 = tpu.matmul %93, %94, %cst_26 {dimension_numbers = #tpu.dot_dimension_numbers<[1], [0], [0], [1], [0, 0, 1, 1], [], []>} : vector<48x32xbf16>, vector<32x128xbf16>, vector<48x128xf32> -> vector<48x128xf32>
    %96 = vector.shape_cast %95 : vector<48x128xf32> to vector<2x24x128xf32>
    %97 = tpu.iota {dimensions = array<i32: 1>} : vector<1x24xi32>
    %c17_i32 = arith.constant 17 : i32
    %98 = vector.broadcast %c17_i32 : i32 to vector<1x24xi32>
    %99 = arith.cmpi slt, %97, %98 : vector<1x24xi32>
    %100 = vector.extract_strided_slice %96 {offsets = [0, 0, 0], sizes = [2, 24, 8], strides = [1, 1, 1]} : vector<2x24x128xf32> to vector<2x24x8xf32>
    %cst_27 = arith.constant 0.353553385 : f32
    %101 = vector.broadcast %cst_27 : f32 to vector<2x24x8xf32>
    %102 = arith.mulf %100, %101 : vector<2x24x8xf32>
    %103 = arith.truncf %102 : vector<2x24x8xf32> to vector<2x24x8xbf16>
    %104 = vector.extract_strided_slice %96 {offsets = [0, 0, 32], sizes = [2, 24, 8], strides = [1, 1, 1]} : vector<2x24x128xf32> to vector<2x24x8xf32>
    %105 = arith.truncf %104 : vector<2x24x8xf32> to vector<2x24x8xbf16>
    %106 = vector.extract_strided_slice %96 {offsets = [0, 0, 64], sizes = [2, 24, 8], strides = [1, 1, 1]} : vector<2x24x128xf32> to vector<2x24x8xf32>
    %107 = arith.truncf %106 : vector<2x24x8xf32> to vector<2x24x8xbf16>
    "tpu.trace_start"() <{level = 10 : i32, message = "bqe,bke->bqk"}> : () -> ()
    %cst_28 = arith.constant dense<0.000000e+00> : vector<2x24x24xf32>
    %108 = tpu.matmul %103, %105, %cst_28 {dimension_numbers = #tpu.dot_dimension_numbers<[2], [2], [1], [1], [0, 0, 0, 1, 1, 1], [0], [0]>} : vector<2x24x8xbf16>, vector<2x24x8xbf16>, vector<2x24x24xf32> -> vector<2x24x24xf32>
    %cst_29 = arith.constant -1.000000e+30 : f32
    "tpu.trace_stop"() : () -> ()
    %109 = vector.shape_cast %99 : vector<1x24xi1> to vector<1x1x24xi1>
    %110 = vector.broadcast %109 : vector<1x1x24xi1> to vector<2x24x24xi1>
    %111 = vector.broadcast %cst_29 : f32 to vector<2x24x24xf32>
    %112 = arith.select %110, %108, %111 : vector<2x24x24xi1>, vector<2x24x24xf32>
    %cst_30 = arith.constant dense<0xFF800000> : vector<2x24xf32>
    %113 = vector.multi_reduction <maximumf>, %112, %cst_30 [2] : vector<2x24x24xf32> to vector<2x24xf32>
    %114 = vector.shape_cast %113 : vector<2x24xf32> to vector<2x24x1xf32>
    %115 = vector.broadcast %114 : vector<2x24x1xf32> to vector<2x24x24xf32>
    %116 = arith.subf %112, %115 : vector<2x24x24xf32>
    %117 = math.exp %116 : vector<2x24x24xf32>
    %cst_31 = arith.constant dense<0.000000e+00> : vector<2x24xf32>
    %118 = vector.multi_reduction <add>, %117, %cst_31 [2] : vector<2x24x24xf32> to vector<2x24xf32>
    %119 = vector.shape_cast %118 : vector<2x24xf32> to vector<2x24x1xf32>
    %120 = tpu.reciprocal %119 {approx = true} : vector<2x24x1xf32> -> vector<2x24x1xf32>
    %121 = vector.broadcast %120 : vector<2x24x1xf32> to vector<2x24x24xf32>
    %122 = arith.mulf %117, %121 : vector<2x24x24xf32>
    %123 = arith.truncf %122 : vector<2x24x24xf32> to vector<2x24x24xbf16>
    "tpu.trace_start"() <{level = 10 : i32, message = "bqk,bke->bqe"}> : () -> ()
    %cst_32 = arith.constant dense<0.000000e+00> : vector<2x24x8xf32>
    %124 = tpu.matmul %123, %107, %cst_32 {dimension_numbers = #tpu.dot_dimension_numbers<[2], [1], [1], [2], [0, 0, 0, 1, 1, 2], [0], [0]>} : vector<2x24x24xbf16>, vector<2x24x8xbf16>, vector<2x24x8xf32> -> vector<2x24x8xf32>
    "tpu.trace_stop"() : () -> ()
    %125 = vector.extract_strided_slice %96 {offsets = [0, 0, 8], sizes = [2, 24, 8], strides = [1, 1, 1]} : vector<2x24x128xf32> to vector<2x24x8xf32>
    %cst_33 = arith.constant 0.353553385 : f32
    %126 = vector.broadcast %cst_33 : f32 to vector<2x24x8xf32>
    %127 = arith.mulf %125, %126 : vector<2x24x8xf32>
    %128 = arith.truncf %127 : vector<2x24x8xf32> to vector<2x24x8xbf16>
    %129 = vector.extract_strided_slice %96 {offsets = [0, 0, 40], sizes = [2, 24, 8], strides = [1, 1, 1]} : vector<2x24x128xf32> to vector<2x24x8xf32>
    %130 = arith.truncf %129 : vector<2x24x8xf32> to vector<2x24x8xbf16>
    %131 = vector.extract_strided_slice %96 {offsets = [0, 0, 72], sizes = [2, 24, 8], strides = [1, 1, 1]} : vector<2x24x128xf32> to vector<2x24x8xf32>
    %132 = arith.truncf %131 : vector<2x24x8xf32> to vector<2x24x8xbf16>
    "tpu.trace_start"() <{level = 10 : i32, message = "bqe,bke->bqk"}> : () -> ()
    %cst_34 = arith.constant dense<0.000000e+00> : vector<2x24x24xf32>
    %133 = tpu.matmul %128, %130, %cst_34 {dimension_numbers = #tpu.dot_dimension_numbers<[2], [2], [1], [1], [0, 0, 0, 1, 1, 1], [0], [0]>} : vector<2x24x8xbf16>, vector<2x24x8xbf16>, vector<2x24x24xf32> -> vector<2x24x24xf32>
    %cst_35 = arith.constant -1.000000e+30 : f32
    "tpu.trace_stop"() : () -> ()
    %134 = vector.shape_cast %99 : vector<1x24xi1> to vector<1x1x24xi1>
    %135 = vector.broadcast %134 : vector<1x1x24xi1> to vector<2x24x24xi1>
    %136 = vector.broadcast %cst_35 : f32 to vector<2x24x24xf32>
    %137 = arith.select %135, %133, %136 : vector<2x24x24xi1>, vector<2x24x24xf32>
    %cst_36 = arith.constant dense<0xFF800000> : vector<2x24xf32>
    %138 = vector.multi_reduction <maximumf>, %137, %cst_36 [2] : vector<2x24x24xf32> to vector<2x24xf32>
    %139 = vector.shape_cast %138 : vector<2x24xf32> to vector<2x24x1xf32>
    %140 = vector.broadcast %139 : vector<2x24x1xf32> to vector<2x24x24xf32>
    %141 = arith.subf %137, %140 : vector<2x24x24xf32>
    %142 = math.exp %141 : vector<2x24x24xf32>
    %cst_37 = arith.constant dense<0.000000e+00> : vector<2x24xf32>
    %143 = vector.multi_reduction <add>, %142, %cst_37 [2] : vector<2x24x24xf32> to vector<2x24xf32>
    %144 = vector.shape_cast %143 : vector<2x24xf32> to vector<2x24x1xf32>
    %145 = tpu.reciprocal %144 {approx = true} : vector<2x24x1xf32> -> vector<2x24x1xf32>
    %146 = vector.broadcast %145 : vector<2x24x1xf32> to vector<2x24x24xf32>
    %147 = arith.mulf %142, %146 : vector<2x24x24xf32>
    %148 = arith.truncf %147 : vector<2x24x24xf32> to vector<2x24x24xbf16>
    "tpu.trace_start"() <{level = 10 : i32, message = "bqk,bke->bqe"}> : () -> ()
    %cst_38 = arith.constant dense<0.000000e+00> : vector<2x24x8xf32>
    %149 = tpu.matmul %148, %132, %cst_38 {dimension_numbers = #tpu.dot_dimension_numbers<[2], [1], [1], [2], [0, 0, 0, 1, 1, 2], [0], [0]>} : vector<2x24x24xbf16>, vector<2x24x8xbf16>, vector<2x24x8xf32> -> vector<2x24x8xf32>
    "tpu.trace_stop"() : () -> ()
    %150 = vector.extract_strided_slice %96 {offsets = [0, 0, 16], sizes = [2, 24, 8], strides = [1, 1, 1]} : vector<2x24x128xf32> to vector<2x24x8xf32>
    %cst_39 = arith.constant 0.353553385 : f32
    %151 = vector.broadcast %cst_39 : f32 to vector<2x24x8xf32>
    %152 = arith.mulf %150, %151 : vector<2x24x8xf32>
    %153 = arith.truncf %152 : vector<2x24x8xf32> to vector<2x24x8xbf16>
    %154 = vector.extract_strided_slice %96 {offsets = [0, 0, 48], sizes = [2, 24, 8], strides = [1, 1, 1]} : vector<2x24x128xf32> to vector<2x24x8xf32>
    %155 = arith.truncf %154 : vector<2x24x8xf32> to vector<2x24x8xbf16>
    %156 = vector.extract_strided_slice %96 {offsets = [0, 0, 80], sizes = [2, 24, 8], strides = [1, 1, 1]} : vector<2x24x128xf32> to vector<2x24x8xf32>
    %157 = arith.truncf %156 : vector<2x24x8xf32> to vector<2x24x8xbf16>
    "tpu.trace_start"() <{level = 10 : i32, message = "bqe,bke->bqk"}> : () -> ()
    %cst_40 = arith.constant dense<0.000000e+00> : vector<2x24x24xf32>
    %158 = tpu.matmul %153, %155, %cst_40 {dimension_numbers = #tpu.dot_dimension_numbers<[2], [2], [1], [1], [0, 0, 0, 1, 1, 1], [0], [0]>} : vector<2x24x8xbf16>, vector<2x24x8xbf16>, vector<2x24x24xf32> -> vector<2x24x24xf32>
    %cst_41 = arith.constant -1.000000e+30 : f32
    "tpu.trace_stop"() : () -> ()
    %159 = vector.shape_cast %99 : vector<1x24xi1> to vector<1x1x24xi1>
    %160 = vector.broadcast %159 : vector<1x1x24xi1> to vector<2x24x24xi1>
    %161 = vector.broadcast %cst_41 : f32 to vector<2x24x24xf32>
    %162 = arith.select %160, %158, %161 : vector<2x24x24xi1>, vector<2x24x24xf32>
    %cst_42 = arith.constant dense<0xFF800000> : vector<2x24xf32>
    %163 = vector.multi_reduction <maximumf>, %162, %cst_42 [2] : vector<2x24x24xf32> to vector<2x24xf32>
    %164 = vector.shape_cast %163 : vector<2x24xf32> to vector<2x24x1xf32>
    %165 = vector.broadcast %164 : vector<2x24x1xf32> to vector<2x24x24xf32>
    %166 = arith.subf %162, %165 : vector<2x24x24xf32>
    %167 = math.exp %166 : vector<2x24x24xf32>
    %cst_43 = arith.constant dense<0.000000e+00> : vector<2x24xf32>
    %168 = vector.multi_reduction <add>, %167, %cst_43 [2] : vector<2x24x24xf32> to vector<2x24xf32>
    %169 = vector.shape_cast %168 : vector<2x24xf32> to vector<2x24x1xf32>
    %170 = tpu.reciprocal %169 {approx = true} : vector<2x24x1xf32> -> vector<2x24x1xf32>
    %171 = vector.broadcast %170 : vector<2x24x1xf32> to vector<2x24x24xf32>
    %172 = arith.mulf %167, %171 : vector<2x24x24xf32>
    %173 = arith.truncf %172 : vector<2x24x24xf32> to vector<2x24x24xbf16>
    "tpu.trace_start"() <{level = 10 : i32, message = "bqk,bke->bqe"}> : () -> ()
    %cst_44 = arith.constant dense<0.000000e+00> : vector<2x24x8xf32>
    %174 = tpu.matmul %173, %157, %cst_44 {dimension_numbers = #tpu.dot_dimension_numbers<[2], [1], [1], [2], [0, 0, 0, 1, 1, 2], [0], [0]>} : vector<2x24x24xbf16>, vector<2x24x8xbf16>, vector<2x24x8xf32> -> vector<2x24x8xf32>
    "tpu.trace_stop"() : () -> ()
    %175 = vector.extract_strided_slice %96 {offsets = [0, 0, 24], sizes = [2, 24, 8], strides = [1, 1, 1]} : vector<2x24x128xf32> to vector<2x24x8xf32>
    %cst_45 = arith.constant 0.353553385 : f32
    %176 = vector.broadcast %cst_45 : f32 to vector<2x24x8xf32>
    %177 = arith.mulf %175, %176 : vector<2x24x8xf32>
    %178 = arith.truncf %177 : vector<2x24x8xf32> to vector<2x24x8xbf16>
    %179 = vector.extract_strided_slice %96 {offsets = [0, 0, 56], sizes = [2, 24, 8], strides = [1, 1, 1]} : vector<2x24x128xf32> to vector<2x24x8xf32>
    %180 = arith.truncf %179 : vector<2x24x8xf32> to vector<2x24x8xbf16>
    %181 = vector.extract_strided_slice %96 {offsets = [0, 0, 88], sizes = [2, 24, 8], strides = [1, 1, 1]} : vector<2x24x128xf32> to vector<2x24x8xf32>
    %182 = arith.truncf %181 : vector<2x24x8xf32> to vector<2x24x8xbf16>
    "tpu.trace_start"() <{level = 10 : i32, message = "bqe,bke->bqk"}> : () -> ()
    %cst_46 = arith.constant dense<0.000000e+00> : vector<2x24x24xf32>
    %183 = tpu.matmul %178, %180, %cst_46 {dimension_numbers = #tpu.dot_dimension_numbers<[2], [2], [1], [1], [0, 0, 0, 1, 1, 1], [0], [0]>} : vector<2x24x8xbf16>, vector<2x24x8xbf16>, vector<2x24x24xf32> -> vector<2x24x24xf32>
    %cst_47 = arith.constant -1.000000e+30 : f32
    "tpu.trace_stop"() : () -> ()
    %184 = vector.shape_cast %99 : vector<1x24xi1> to vector<1x1x24xi1>
    %185 = vector.broadcast %184 : vector<1x1x24xi1> to vector<2x24x24xi1>
    %186 = vector.broadcast %cst_47 : f32 to vector<2x24x24xf32>
    %187 = arith.select %185, %183, %186 : vector<2x24x24xi1>, vector<2x24x24xf32>
    %cst_48 = arith.constant dense<0xFF800000> : vector<2x24xf32>
    %188 = vector.multi_reduction <maximumf>, %187, %cst_48 [2] : vector<2x24x24xf32> to vector<2x24xf32>
    %189 = vector.shape_cast %188 : vector<2x24xf32> to vector<2x24x1xf32>
    %190 = vector.broadcast %189 : vector<2x24x1xf32> to vector<2x24x24xf32>
    %191 = arith.subf %187, %190 : vector<2x24x24xf32>
    %192 = math.exp %191 : vector<2x24x24xf32>
    %cst_49 = arith.constant dense<0.000000e+00> : vector<2x24xf32>
    %193 = vector.multi_reduction <add>, %192, %cst_49 [2] : vector<2x24x24xf32> to vector<2x24xf32>
    %194 = vector.shape_cast %193 : vector<2x24xf32> to vector<2x24x1xf32>
    %195 = tpu.reciprocal %194 {approx = true} : vector<2x24x1xf32> -> vector<2x24x1xf32>
    %196 = vector.broadcast %195 : vector<2x24x1xf32> to vector<2x24x24xf32>
    %197 = arith.mulf %192, %196 : vector<2x24x24xf32>
    %198 = arith.truncf %197 : vector<2x24x24xf32> to vector<2x24x24xbf16>
    "tpu.trace_start"() <{level = 10 : i32, message = "bqk,bke->bqe"}> : () -> ()
    %cst_50 = arith.constant dense<0.000000e+00> : vector<2x24x8xf32>
    %199 = tpu.matmul %198, %182, %cst_50 {dimension_numbers = #tpu.dot_dimension_numbers<[2], [1], [1], [2], [0, 0, 0, 1, 1, 2], [0], [0]>} : vector<2x24x24xbf16>, vector<2x24x8xbf16>, vector<2x24x8xf32> -> vector<2x24x8xf32>
    "tpu.trace_stop"() : () -> ()
    %200 = tpu.concatenate %124, %149, %174, %199 in 2 : vector<2x24x8xf32>, vector<2x24x8xf32>, vector<2x24x8xf32>, vector<2x24x8xf32> -> vector<2x24x32xf32>
    %201 = vector.shape_cast %200 : vector<2x24x32xf32> to vector<48x32xf32>
    %202 = arith.truncf %201 : vector<48x32xf32> to vector<48x32xbf16>
    %c0_51 = arith.constant 0 : index
    %c0_52 = arith.constant 0 : index
    %203 = vector.load %arg8[%c0_51, %c0_52] : memref<32x32xbf16, #tpu.memory_space<vmem>>, vector<32x32xbf16>
    %cst_53 = arith.constant dense<0.000000e+00> : vector<48x32xf32>
    %204 = tpu.matmul %202, %203, %cst_53 {dimension_numbers = #tpu.dot_dimension_numbers<[1], [0], [0], [1], [0, 0, 1, 1], [], []>} : vector<48x32xbf16>, vector<32x32xbf16>, vector<48x32xf32> -> vector<48x32xf32>
    %205 = vector.broadcast %8 : vector<1x32xf32> to vector<48x32xf32>
    %206 = arith.addf %204, %205 : vector<48x32xf32>
    %207 = arith.addf %70, %206 : vector<48x32xf32>
    %cst_54 = arith.constant dense<0.000000e+00> : vector<48xf32>
    %208 = vector.multi_reduction <add>, %207, %cst_54 [1] : vector<48x32xf32> to vector<48xf32>
    %209 = vector.shape_cast %208 : vector<48xf32> to vector<48x1xf32>
    %cst_55 = arith.constant 3.200000e+01 : f32
    %210 = vector.broadcast %cst_55 : f32 to vector<48x1xf32>
    %211 = arith.divf %209, %210 : vector<48x1xf32>
    %212 = vector.broadcast %211 : vector<48x1xf32> to vector<48x32xf32>
    %213 = arith.subf %207, %212 : vector<48x32xf32>
    %214 = arith.mulf %213, %213 : vector<48x32xf32>
    %cst_56 = arith.constant dense<0.000000e+00> : vector<48xf32>
    %215 = vector.multi_reduction <add>, %214, %cst_56 [1] : vector<48x32xf32> to vector<48xf32>
    %216 = vector.shape_cast %215 : vector<48xf32> to vector<48x1xf32>
    %cst_57 = arith.constant 3.200000e+01 : f32
    %217 = vector.broadcast %cst_57 : f32 to vector<48x1xf32>
    %218 = arith.divf %216, %217 : vector<48x1xf32>
    %219 = vector.broadcast %211 : vector<48x1xf32> to vector<48x32xf32>
    %220 = arith.subf %207, %219 : vector<48x32xf32>
    %cst_58 = arith.constant 9.99999974E-6 : f32
    %221 = vector.broadcast %cst_58 : f32 to vector<48x1xf32>
    %222 = arith.addf %218, %221 : vector<48x1xf32>
    %223 = math.rsqrt %222 : vector<48x1xf32>
    %224 = vector.broadcast %223 : vector<48x1xf32> to vector<48x32xf32>
    %225 = arith.mulf %220, %224 : vector<48x32xf32>
    %226 = vector.broadcast %9 : vector<1x32xf32> to vector<48x32xf32>
    %227 = arith.mulf %225, %226 : vector<48x32xf32>
    %228 = vector.broadcast %10 : vector<1x32xf32> to vector<48x32xf32>
    %229 = arith.addf %227, %228 : vector<48x32xf32>
    %230 = arith.truncf %229 : vector<48x32xf32> to vector<48x32xbf16>
    %c0_59 = arith.constant 0 : index
    %c0_60 = arith.constant 0 : index
    %231 = vector.load %arg9[%c0_59, %c0_60] : memref<32x128xbf16, #tpu.memory_space<vmem>>, vector<32x128xbf16>
    %cst_61 = arith.constant dense<0.000000e+00> : vector<48x128xf32>
    %232 = tpu.matmul %230, %231, %cst_61 {dimension_numbers = #tpu.dot_dimension_numbers<[1], [0], [0], [1], [0, 0, 1, 1], [], []>} : vector<48x32xbf16>, vector<32x128xbf16>, vector<48x128xf32> -> vector<48x128xf32>
    %233 = vector.broadcast %11 : vector<1x128xf32> to vector<48x128xf32>
    %234 = arith.addf %232, %233 : vector<48x128xf32>
    %235 = arith.mulf %234, %234 : vector<48x128xf32>
    %236 = arith.mulf %234, %235 : vector<48x128xf32>
    %cst_62 = arith.constant 4.471500e-02 : f32
    %237 = vector.broadcast %cst_62 : f32 to vector<48x128xf32>
    %238 = arith.mulf %237, %236 : vector<48x128xf32>
    %239 = arith.addf %234, %238 : vector<48x128xf32>
    %cst_63 = arith.constant 0.797884583 : f32
    %240 = vector.broadcast %cst_63 : f32 to vector<48x128xf32>
    %241 = arith.mulf %240, %239 : vector<48x128xf32>
    %242 = math.tanh %241 : vector<48x128xf32>
    %cst_64 = arith.constant 1.000000e+00 : f32
    %243 = vector.broadcast %cst_64 : f32 to vector<48x128xf32>
    %244 = arith.addf %243, %242 : vector<48x128xf32>
    %cst_65 = arith.constant 5.000000e-01 : f32
    %245 = vector.broadcast %cst_65 : f32 to vector<48x128xf32>
    %246 = arith.mulf %245, %244 : vector<48x128xf32>
    %247 = arith.mulf %234, %246 : vector<48x128xf32>
    %248 = arith.truncf %247 : vector<48x128xf32> to vector<48x128xbf16>
    %c0_66 = arith.constant 0 : index
    %c0_67 = arith.constant 0 : index
    %249 = vector.load %arg10[%c0_66, %c0_67] : memref<128x32xbf16, #tpu.memory_space<vmem>>, vector<128x32xbf16>
    %cst_68 = arith.constant dense<0.000000e+00> : vector<48x32xf32>
    %250 = tpu.matmul %248, %249, %cst_68 {dimension_numbers = #tpu.dot_dimension_numbers<[1], [0], [0], [1], [0, 0, 1, 1], [], []>} : vector<48x128xbf16>, vector<128x32xbf16>, vector<48x32xf32> -> vector<48x32xf32>
    %251 = vector.broadcast %12 : vector<1x32xf32> to vector<48x32xf32>
    %252 = arith.addf %250, %251 : vector<48x32xf32>
    %253 = arith.addf %207, %252 : vector<48x32xf32>
    %c0_69 = arith.constant 0 : index
    %c0_70 = arith.constant 0 : index
    %254 = vector.load %arg5[%c0_69, %c0_70] : memref<2x48xf32, #tpu.memory_space<vmem>>, vector<2x48xf32>
    %cst_71 = arith.constant dense<0.000000e+00> : vector<2x32xf32>
    %255 = tpu.matmul %254, %253, %cst_71 {dimension_numbers = #tpu.dot_dimension_numbers<[1], [0], [0], [1], [0, 0, 1, 1], [], []>} : vector<2x48xf32>, vector<48x32xf32>, vector<2x32xf32> -> vector<2x32xf32>
    %cst_72 = arith.constant dense<0.000000e+00> : vector<2xf32>
    %256 = vector.multi_reduction <add>, %255, %cst_72 [1] : vector<2x32xf32> to vector<2xf32>
    %257 = vector.shape_cast %256 : vector<2xf32> to vector<2x1xf32>
    %cst_73 = arith.constant 3.200000e+01 : f32
    %258 = vector.broadcast %cst_73 : f32 to vector<2x1xf32>
    %259 = arith.divf %257, %258 : vector<2x1xf32>
    %260 = vector.broadcast %259 : vector<2x1xf32> to vector<2x32xf32>
    %261 = arith.subf %255, %260 : vector<2x32xf32>
    %262 = arith.mulf %261, %261 : vector<2x32xf32>
    %cst_74 = arith.constant dense<0.000000e+00> : vector<2xf32>
    %263 = vector.multi_reduction <add>, %262, %cst_74 [1] : vector<2x32xf32> to vector<2xf32>
    %264 = vector.shape_cast %263 : vector<2xf32> to vector<2x1xf32>
    %cst_75 = arith.constant 3.200000e+01 : f32
    %265 = vector.broadcast %cst_75 : f32 to vector<2x1xf32>
    %266 = arith.divf %264, %265 : vector<2x1xf32>
    %267 = vector.broadcast %259 : vector<2x1xf32> to vector<2x32xf32>
    %268 = arith.subf %255, %267 : vector<2x32xf32>
    %cst_76 = arith.constant 9.99999974E-6 : f32
    %269 = vector.broadcast %cst_76 : f32 to vector<2x1xf32>
    %270 = arith.addf %266, %269 : vector<2x1xf32>
    %271 = math.rsqrt %270 : vector<2x1xf32>
    %272 = vector.broadcast %271 : vector<2x1xf32> to vector<2x32xf32>
    %273 = arith.mulf %268, %272 : vector<2x32xf32>
    %274 = vector.broadcast %13 : vector<1x32xf32> to vector<2x32xf32>
    %275 = arith.mulf %273, %274 : vector<2x32xf32>
    %276 = vector.broadcast %14 : vector<1x32xf32> to vector<2x32xf32>
    %277 = arith.addf %275, %276 : vector<2x32xf32>
    %278 = arith.truncf %277 : vector<2x32xf32> to vector<2x32xbf16>
    %c0_77 = arith.constant 0 : index
    %c0_78 = arith.constant 0 : index
    %279 = vector.load %arg11[%c0_77, %c0_78] : memref<32x128xbf16, #tpu.memory_space<vmem>>, vector<32x128xbf16>
    %cst_79 = arith.constant dense<0.000000e+00> : vector<2x128xf32>
    %280 = tpu.matmul %278, %279, %cst_79 {dimension_numbers = #tpu.dot_dimension_numbers<[1], [0], [0], [1], [0, 0, 1, 1], [], []>} : vector<2x32xbf16>, vector<32x128xbf16>, vector<2x128xf32> -> vector<2x128xf32>
    %281 = vector.broadcast %15 : vector<1x128xf32> to vector<2x128xf32>
    %282 = arith.addf %280, %281 : vector<2x128xf32>
    %c0_80 = arith.constant 0 : index
    %c0_81 = arith.constant 0 : index
    %283 = vector.load %arg12[%c0_80, %c0_81] : memref<2x128xf32, #tpu.memory_space<vmem>>, vector<2x128xf32>
    tpu.vector_store %arg12[%c0_80, %c0_81], %282 {strides = array<i32>} : memref<2x128xf32, #tpu.memory_space<vmem>>, vector<2x128xf32>,
    return
  }
  func.func @transform_0(%arg0: i32) -> (i32, i32) {
    %c0_i32 = arith.constant 0 : i32
    %c0_i32_0 = arith.constant 0 : i32
    %c0_i32_1 = arith.constant 0 : i32
    return %c0_i32, %c0_i32_0 : i32, i32
  }
  func.func @transform_1(%arg0: i32) -> (i32, i32) {
    %c0_i32 = arith.constant 0 : i32
    %c0_i32_0 = arith.constant 0 : i32
    %c0_i32_1 = arith.constant 0 : i32
    return %c0_i32, %c0_i32_0 : i32, i32
  }
  func.func @transform_2(%arg0: i32) -> (i32, i32) {
    %c0_i32 = arith.constant 0 : i32
    %c0_i32_0 = arith.constant 0 : i32
    %c0_i32_1 = arith.constant 0 : i32
    return %c0_i32, %c0_i32_0 : i32, i32
  }
  func.func @transform_3(%arg0: i32) -> (i32, i32) {
    %c0_i32 = arith.constant 0 : i32
    %c0_i32_0 = arith.constant 0 : i32
    %c0_i32_1 = arith.constant 0 : i32
    return %c0_i32, %c0_i32_0 : i32, i32
  }
  func.func @transform_4(%arg0: i32) -> (i32, i32) {
    %c0_i32 = arith.constant 0 : i32
    %c0_i32_0 = arith.constant 0 : i32
    %c0_i32_1 = arith.constant 0 : i32
    return %c0_i32, %c0_i32_0 : i32, i32
  }
  func.func @transform_5(%arg0: i32) -> (i32, i32) {
    %c0_i32 = arith.constant 0 : i32
    %c0_i32_0 = arith.constant 0 : i32
    %c0_i32_1 = arith.constant 0 : i32
    return %c0_i32, %c0_i32_0 : i32, i32
  }
  func.func @transform_6(%arg0: i32) -> (i32, i32) {
    %c0_i32 = arith.constant 0 : i32
    %c0_i32_0 = arith.constant 0 : i32
    %c0_i32_1 = arith.constant 0 : i32
    return %c0_i32, %c0_i32_0 : i32, i32
  }
  func.func @transform_7(%arg0: i32) -> (i32, i32) {
    %c0_i32 = arith.constant 0 : i32
    %c0_i32_0 = arith.constant 0 : i32
    %c0_i32_1 = arith.constant 0 : i32
    return %c0_i32, %c0_i32_0 : i32, i32
  }
  func.func @transform_8(%arg0: i32) -> (i32, i32) {
    %c0_i32 = arith.constant 0 : i32
    %c0_i32_0 = arith.constant 0 : i32
    %c0_i32_1 = arith.constant 0 : i32
    return %c0_i32, %c0_i32_0 : i32, i32
  }
  func.func @transform_9(%arg0: i32) -> (i32, i32) {
    %c0_i32 = arith.constant 0 : i32
    %c0_i32_0 = arith.constant 0 : i32
    %c0_i32_1 = arith.constant 0 : i32
    return %c0_i32, %c0_i32_0 : i32, i32
  }
  func.func @transform_10(%arg0: i32) -> (i32, i32) {
    %c0_i32 = arith.constant 0 : i32
    %c0_i32_0 = arith.constant 0 : i32
    %c0_i32_1 = arith.constant 0 : i32
    return %c0_i32, %c0_i32_0 : i32, i32
  }
  func.func @transform_11(%arg0: i32) -> (i32, i32) {
    %c0_i32 = arith.constant 0 : i32
    %c0_i32_0 = arith.constant 0 : i32
    %c0_i32_1 = arith.constant 0 : i32
    return %c0_i32, %c0_i32_0 : i32, i32
  }
}

</mosaic_0001>

<bundles_post_ra>
// kernel: tpu_custom_call.1
= control target key start
LH: loop header
LB: loop body
LE: loop exit
PB: predicated region body
PF: predicated region fallthrough
CT: control target
= control target key end

     0   :  { %vm48_vm0 = vcmask 523264   ;;  %s4315_s0 = inlined_call_operand.vmem [shape: f32[48,64], index: 0, kind: input, shape index: {}]   ;;  %s4316_s1 = inlined_call_operand.vmem [shape: f32[48,1], index: 1, kind: input, shape index: {}]   ;;  %s4317_s2 = inlined_call_operand.vmem [shape: f32[48,32], index: 2, kind: input, shape index: {}]   ;;  %s4318_s3 = inlined_call_operand.vmem [shape: f32[16,128], index: 3, kind: input, shape index: {}]   ;;  %s4319_s4 = inlined_call_operand.vmem [shape: f32[2,48], index: 4, kind: input, shape index: {}]   ;;  %s4320_s5 = inlined_call_operand.vmem [shape: bf16[64,32], index: 5, kind: input, shape index: {}]   ;;  %s4321_s6 = inlined_call_operand.vmem [shape: bf16[32,128], index: 6, kind: input, shape index: {}]   ;;  %s4322_s7 = inlined_call_operand.vmem [shape: bf16[32,32], index: 7, kind: input, shape index: {}]   ;;  %s4323_s8 = inlined_call_operand.vmem [shape: bf16[32,128], index: 8, kind: input, shape index: {}]   ;;  %s4324_s9 = inlined_call_operand.vmem [shape: bf16[128,32], index: 9, kind: input, shape index: {}]   ;;  %s4325_s10 = inlined_call_operand.vmem [shape: bf16[32,128], index: 10, kind: input, shape index: {}]   ;;  %s4326_s11 = inlined_call_operand.hbm [shape: f32[2,128], index: 11, kind: output, shape index: {}]  }
   0x1   :  { %v42_v0 = vld [vmem:[%s4315_s0] sm:$0xff]  ;;  %v44_v1 = vld [vmem:[%s4315_s0 + $0x10] sm:$0xff]  ;;  %v43_v2 = vld [vmem:[%s4315_s0 + $0x8] sm:$0xff] }
   0x2   :  { %v49_v3 = vsel %vm48_vm0, %v42_v0, 0.0  ;;  %v55_v4 = vsel %vm48_vm0, %v44_v1, 0.0  ;;  %v45_v5 = vld [vmem:[%s4315_s0 + $0x18] sm:$0xff]  ;;  %v46_v6 = vld [vmem:[%s4315_s0 + $0x20] sm:$0xff]  ;;  %v47_v7 = vld [vmem:[%s4315_s0 + $0x28] sm:$0xff]  ;;  %v52_v8 = vsel %vm48_vm0, %v43_v2, 0.0 }
   0x3   :  { %50 = vadd.xlane.f32.xlu0 %v49_v3  ;;  %56 = vadd.xlane.f32.xlu1 %v55_v4  ;;  %v58_v9 = vsel %vm48_vm0, %v45_v5, 0.0  ;;  %v61_v10 = vsel %vm48_vm0, %v46_v6, 0.0  ;;  %v64_v11 = vsel %vm48_vm0, %v47_v7, 0.0 }
   0x7   :  { %53 = vadd.xlane.f32.xlu0 %v52_v8  ;;  %59 = vadd.xlane.f32.xlu1 %v58_v9 }
   0xb   :  { %62 = vadd.xlane.f32.xlu0 %v61_v10  ;;  %65 = vadd.xlane.f32.xlu1 %v64_v11 }
   0xc   :  { %16 = vsyncpa [#allocation3], 0  ;;  %v3214_v42 = vld [vmem:[%s4320_s5] sm:$0xff]   ;;  %v3417_v43 = vmov 0.0   ;;  %v3215_v44 = vld [vmem:[%s4320_s5 + $0x8] sm:$0xff]   ;;  %vm3418_vm1 = vmmov 0   ;;  %v128_v52 = vlaneseq }
   0xd   :  { %2868 = vmatprep.subr.bf16.mxu0 %v3417_v43  ;;  %2888 = vmatprep.subr.bf16.mxu1 %v3417_v43  ;;  %v3216_v45 = vld [vmem:[%s4320_s5 + $0x10] sm:$0xff]   ;;  %v3217_v46 = vld [vmem:[%s4320_s5 + $0x18] sm:$0xff]   ;;  %vm253_vm2 = vcmask 261120   ;;  %vm613_vm3 = vcmask 64512   ;;  %vm748_vm5 = vcmask 195584   ;;  %s3421_s23 = smov 64  }
   0xe   :  { %2869 = vmatpush3.bf16.msra.mxu0 %v3214_v42  ;;  %2876 = vmatprep.mubr.msk.bf16.mxu0 %vm3418_vm1, %v3417_v43  ;;  %v3572_v59 = vshrl.u32 %v128_v52, 7  ;;  %s3422_s24 = smov 88   ;;  %vm830_vm6 = vcmask 1043456   ;;  %s3423_s25 = smov 120   ;;  %vm2034_vm7 = vcmask 130048   ;;  %vm2518_vm8 = vcmask 392192  }
   0xf   :  { %2870 = vmatprep.subr.bf16.mxu0 %v3417_v43  ;;  %2892 = vmatprep.mubr.msk.bf16.mxu1 %vm3418_vm1, %v3417_v43  ;;  %s3424_s26 = smov 56   ;;  %s3425_s27 = smov 80   ;;  %vm2592_vm9 = vcmask 254976  }
  0x10   :  { %v140_v8 = vsub.s32 1, %v3572_v59  ;;  %s3426_s28 = smov 112   ;;  %s3427_s0 = smov 48  }
  0x11   :  { %s3429_s29 = smov 104   ;;  %s3430_s30 = smov 40  }
  0x12   :  { %2871 = vmatpush3.bf16.msra.mxu0 %v3215_v44  ;;  %s3431_s12 = smov 8   ;;  %s3432_s13 = smov 16  }
  0x13   :  { %2872 = vmatprep.subr.bf16.mxu0 %v3417_v43  ;;  %s3433_s17 = smov 24  }
  0x16   :  { %2873 = vmatpush3.bf16.msra.mxu0 %v3216_v45 }
  0x17   :  { %2874 = vmatprep.subr.bf16.mxu0 %v3417_v43 }
  0x1a   :  { %2875 = vmatpush3.bf16.msra.mxu0 %v3217_v46 }
  0x90   :  { %v51_v12 = vpop.xlane.xlu0 %50  ;;  %v57_v13 = vpop.xlane.xlu1 %56 }
  0x91   :  { %v68_v14 = vmul.f32 0.015625, %v51_v12  ;;  %v70_v15 = vmul.f32 0.015625, %v57_v13 }
  0x93   :  { %v3520_v16 = vsub.f32 %v42_v0, %v68_v14  ;;  %v3522_v17 = vsub.f32 %v44_v1, %v70_v15  ;;  %v130_v0 = vsub.s32 0, %v3572_v59 }
  0x94   :  { %v54_v18 = vpop.xlane.xlu0 %53  ;;  %v60_v19 = vpop.xlane.xlu1 %59 }
  0x95   :  { %v69_v20 = vmul.f32 0.015625, %v54_v18  ;;  %v71_v21 = vmul.f32 0.015625, %v60_v19  ;;  %v80_v22 = vmul.f32 %v3520_v16, %v3520_v16  ;;  %v82_v23 = vmul.f32 %v3522_v17, %v3522_v17 }
  0x97   :  { %v3528_v24 = vsub.f32 %v43_v2, %v69_v20  ;;  %v3530_v25 = vsub.f32 %v45_v5, %v71_v21  ;;  %v86_v26 = vsel %vm48_vm0, %v80_v22, 0.0  ;;  %v92_v29 = vsel %vm48_vm0, %v82_v23, 0.0  ;;  %v3578_v2 = vld [vmem:[%s4318_s3] sm:$0xff] }
  0x98   :  { %87 = vadd.xlane.f32.xlu0 %v86_v26  ;;  %v63_v27 = vpop.xlane.xlu0 %62  ;;  %v66_v28 = vpop.xlane.xlu1 %65  ;;  %v141_v12 = vrot.slane %v3578_v2, %v140_v8 }
  0x99   :  { %v72_v30 = vmul.f32 0.015625, %v63_v27  ;;  %v73_v31 = vmul.f32 0.015625, %v66_v28  ;;  %v81_v32 = vmul.f32 %v3528_v24, %v3528_v24  ;;  %v83_v33 = vmul.f32 %v3530_v25, %v3530_v25 }
  0x9b   :  { %v3538_v34 = vsub.f32 %v46_v6, %v72_v30  ;;  %v3540_v35 = vsub.f32 %v47_v7, %v73_v31  ;;  %v89_v36 = vsel %vm48_vm0, %v81_v32, 0.0  ;;  %v95_v37 = vsel %vm48_vm0, %v83_v33, 0.0 }
  0x9c   :  { %93 = vadd.xlane.f32.xlu0 %v92_v29  ;;  %90 = vadd.xlane.f32.xlu1 %v89_v36  ;;  %v131_v7 = vrot.slane %v3578_v2, %v130_v0 }
  0x9d   :  { %v84_v38 = vmul.f32 %v3538_v34, %v3538_v34  ;;  %v85_v39 = vmul.f32 %v3540_v35, %v3540_v35 }
  0x9f   :  { %v98_v40 = vsel %vm48_vm0, %v84_v38, 0.0  ;;  %v101_v41 = vsel %vm48_vm0, %v85_v39, 0.0 }
  0xa0   :  { %96 = vadd.xlane.f32.xlu1 %v95_v37  ;;  %99 = vadd.xlane.f32.xlu0 %v98_v40  ;;  %v161_v37 = vsub.s32 2, %v3572_v59 }
  0xa4   :  { %102 = vadd.xlane.f32.xlu1 %v101_v41 }
 0x125   :  { %v88_v47 = vpop.xlane.xlu0 %87 }
 0x126   :  { %v104_v48 = vmul.f32 0.015625, %v88_v47 }
 0x128   :  { %v110_v49 = vadd.f32 1e-05, %v104_v48 }
 0x129   :  { %v91_v50 = vpop.xlane.xlu1 %90  ;;  %v94_v51 = vpop.xlane.xlu0 %93 }
 0x12a   :  { %3234 = vrsqrt.f32 %v110_v49  ;;  %v105_v53 = vmul.f32 0.015625, %v91_v50  ;;  %v106_v54 = vmul.f32 0.015625, %v94_v51 }
 0x12c   :  { %v111_v55 = vadd.f32 1e-05, %v105_v53  ;;  %v112_v56 = vadd.f32 1e-05, %v106_v54 }
 0x12d   :  { %v97_v57 = vpop.xlane.xlu1 %96  ;;  %v100_v58 = vpop.xlane.xlu0 %99 }
 0x12e   :  { %3236 = vrsqrt.f32 %v111_v55  ;;  %v107_v60 = vmul.f32 0.015625, %v97_v57  ;;  %v108_v62 = vmul.f32 0.015625, %v100_v58 }
 0x12f   :  { %3238 = vrsqrt.f32 %v112_v56 }
 0x130   :  { %v113_v61 = vadd.f32 1e-05, %v107_v60  ;;  %v114_v4 = vadd.f32 1e-05, %v108_v62 }
 0x131   :  { %v103_v63 = vpop.xlane.xlu1 %102 }
 0x132   :  { %3240 = vrsqrt.f32 %v113_v61  ;;  %v109_v1 = vmul.f32 0.015625, %v103_v63 }
 0x134   :  { %v3235_v3 = vpop.eup %3234  ;;  %v115_v5 = vadd.f32 1e-05, %v109_v1  ;;  %v3419_v1 = vmov 0  }
 0x135   :  { %v122_v6 = vmul.f32 %v3235_v3, %v3520_v16  ;;  %3168 = vset.pattern.permute.xlu1 %v3419_v1  ;;  %3167 = vset.pattern.permute.xlu0 %v3419_v1 }
 0x136   :  { %3242 = vrsqrt.f32 %v115_v5 }
 0x137   :  { %3244 = vrsqrt.f32 %v114_v4  ;;  %v132_v11 = vmul.f32 %v131_v7, %v122_v6 }
 0x138   :  { %v3237_v9 = vpop.eup %3236 }
 0x139   :  { %v123_v10 = vmul.f32 %v3237_v9, %v3528_v24  ;;  %v3239_v13 = vpop.eup %3238  ;;  %v142_v16 = vadd.f32 %v141_v12, %v132_v11 }
 0x13a   :  { %v124_v19 = vmul.f32 %v3239_v13, %v3522_v17 }
 0x13b   :  { %v133_v14 = vmul.f32 %v131_v7, %v123_v10 }
 0x13c   :  { %v3241_v15 = vpop.eup %3240  ;;  %v134_v24 = vmul.f32 %v131_v7, %v124_v19 }
 0x13d   :  { %v143_v18 = vadd.f32 %v141_v12, %v133_v14  ;;  %v125_v20 = vmul.f32 %v3241_v15, %v3530_v25 }
 0x13e   :  { %v144_v29 = vadd.f32 %v141_v12, %v134_v24 }
 0x13f   :  { %v148_v21 = vpack.c.bf16 %v143_v18, %v142_v16  ;;  %v135_v22 = vmul.f32 %v131_v7, %v125_v20 }
 0x140   :  { %v3243_v23 = vpop.eup %3242 }
 0x141   :  { %2877 = vmatmul.mubr.msk.bf16.vlgmr.msra.gmra.mrb[0].mxu0 %vm48_vm0, %v148_v21  ;;  %v3245_v26 = vpop.eup %3244  ;;  %v145_v27 = vadd.f32 %v141_v12, %v135_v22  ;;  %v127_v28 = vmul.f32 %v3243_v23, %v3540_v35  ;;  %v162_v35 = vrot.slane %v3578_v2, %v161_v37 }
 0x142   :  { %2880 = vmatprep.mubr.msk.bf16.mxu0 %vm3418_vm1, %v3417_v43  ;;  %v126_v30 = vmul.f32 %v3245_v26, %v3538_v34 }
 0x143   :  { %v149_v31 = vpack.c.bf16 %v145_v27, %v144_v29  ;;  %v137_v17 = vmul.f32 %v131_v7, %v127_v28 }
 0x144   :  { %v136_v25 = vmul.f32 %v131_v7, %v126_v30 }
 0x145   :  { %v147_v32 = vadd.f32 %v141_v12, %v137_v17  ;;  %v355_v17 = vld [vmem:[%s4316_s1 + $0x10] sm:$0xff] }
 0x146   :  { %v146_v33 = vadd.f32 %v141_v12, %v136_v25  ;;  %v356_v25 = vld [vmem:[%s4316_s1 + $0x18] sm:$0xff] }
 0x148   :  { %v150_v36 = vpack.c.bf16 %v147_v32, %v146_v33  ;;  %v353_v32 = vld [vmem:[%s4316_s1] sm:$0xff] }
 0x149   :  { %2881 = vmatmul.mubr.msk.bf16.gmra.mrb[4].mxu0 %vm48_vm0, %v149_v31  ;;  %v354_v31 = vld [vmem:[%s4316_s1 + $0x8] sm:$0xff]  ;;  %v357_v33 = vld [vmem:[%s4316_s1 + $0x20] sm:$0xff] }
 0x14a   :  { %2884 = vmatprep.mubr.msk.bf16.mxu0 %vm3418_vm1, %v3417_v43 }
 0x151   :  { %2885 = vmatmul.mubr.msk.bf16.gmra.mrb[8].mxu0 %vm48_vm0, %v150_v36 }
 0x214   :  { %v230_v34 = vpop.f32.mrb[0].mxu0 }
 0x215   :  { %v231_v38 = vadd.f32 %v230_v34, %v162_v35  ;;  %v2878_v39 = vpop.f32.mrb[1].mxu0 }
 0x216   :  { %v233_v40 = vpop.f32.mrb[2].mxu0 }
 0x217   :  { %v234_v41 = vadd.f32 %v233_v40, %v162_v35  ;;  %v2879_v42 = vpop.f32.mrb[3].mxu0  ;;  %v254_v44 = vsel %vm253_vm2, %v231_v38, 0.0  ;;  %v358_v40 = vld [vmem:[%s4316_s1 + $0x28] sm:$0xff]  ;;  %s3428_s1 = smov 72  }
 0x218   :  { %255 = vadd.xlane.f32.xlu0 %v254_v44 }
 0x219   :  { %v257_v45 = vsel %vm253_vm2, %v234_v41, 0.0 }
 0x21a   :  { %258 = vadd.xlane.f32.xlu1 %v257_v45 }
 0x21c   :  { %v238_v46 = vpop.f32.mrb[4].mxu0 }
 0x21d   :  { %v239_v47 = vadd.f32 %v238_v46, %v162_v35  ;;  %v2882_v48 = vpop.f32.mrb[5].mxu0 }
 0x21e   :  { %v241_v49 = vpop.f32.mrb[6].mxu0 }
 0x21f   :  { %v242_v50 = vadd.f32 %v241_v49, %v162_v35  ;;  %v2883_v51 = vpop.f32.mrb[7].mxu0  ;;  %v260_v53 = vsel %vm253_vm2, %v239_v47, 0.0 }
 0x220   :  { %261 = vadd.xlane.f32.xlu0 %v260_v53 }
 0x221   :  { %v263_v54 = vsel %vm253_vm2, %v242_v50, 0.0 }
 0x222   :  { %264 = vadd.xlane.f32.xlu1 %v263_v54  ;;  %v335_v54 = vsub.s32 3, %v3572_v59 }
 0x224   :  { %v246_v55 = vpop.f32.mrb[8].mxu0 }
 0x225   :  { %v247_v56 = vadd.f32 %v246_v55, %v162_v35  ;;  %v2886_v57 = vpop.f32.mrb[9].mxu0 }
 0x226   :  { %v249_v58 = vpop.f32.mrb[10].mxu0  ;;  %v336_v57 = vrot.slane %v3578_v2, %v335_v54 }
 0x227   :  { %v250_v60 = vadd.f32 %v249_v58, %v162_v35  ;;  %v2887_v61 = vpop.f32.mrb[11].mxu0  ;;  %v266_v62 = vsel %vm253_vm2, %v247_v56, 0.0  ;;  %v345_v58 = vsub.s32 4, %v3572_v59 }
 0x228   :  { %267 = vadd.xlane.f32.xlu0 %v266_v62 }
 0x229   :  { %v269_v63 = vsel %vm253_vm2, %v250_v60, 0.0 }
 0x22a   :  { %270 = vadd.xlane.f32.xlu1 %v269_v63 }
 0x2a5   :  { %v256_v3 = vpop.xlane.xlu0 %255 }
 0x2a6   :  { %v273_v4 = vmul.f32 0.03125, %v256_v3  ;;  %v346_v3 = vrot.slane %v3578_v2, %v345_v58 }
 0x2a7   :  { %v259_v5 = vpop.xlane.xlu1 %258 }
 0x2a8   :  { %v3610_v6 = vsub.f32 %v231_v38, %v273_v4  ;;  %v274_v7 = vmul.f32 0.03125, %v259_v5 }
 0x2aa   :  { %v3612_v9 = vsub.f32 %v234_v41, %v274_v7  ;;  %v285_v10 = vmul.f32 %v3610_v6, %v3610_v6 }
 0x2ac   :  { %v291_v11 = vsel %vm253_vm2, %v285_v10, 0.0  ;;  %v286_v12 = vmul.f32 %v3612_v9, %v3612_v9 }
 0x2ad   :  { %v262_v13 = vpop.xlane.xlu0 %261  ;;  %292 = vadd.xlane.f32.xlu0 %v291_v11 }
 0x2ae   :  { %v275_v14 = vmul.f32 0.03125, %v262_v13  ;;  %v294_v15 = vsel %vm253_vm2, %v286_v12, 0.0  ;;  %v396_v13 = vld [vmem:[%s4317_s2 + $0x8] sm:$0xff] }
 0x2af   :  { %v265_v16 = vpop.xlane.xlu1 %264  ;;  %295 = vadd.xlane.f32.xlu1 %v294_v15 }
 0x2b0   :  { %v3620_v18 = vsub.f32 %v239_v47, %v275_v14  ;;  %v276_v19 = vmul.f32 0.03125, %v265_v16 }
 0x2b2   :  { %v3622_v20 = vsub.f32 %v242_v50, %v276_v19  ;;  %v287_v21 = vmul.f32 %v3620_v18, %v3620_v18 }
 0x2b4   :  { %v297_v22 = vsel %vm253_vm2, %v287_v21, 0.0  ;;  %v288_v23 = vmul.f32 %v3622_v20, %v3622_v20 }
 0x2b5   :  { %298 = vadd.xlane.f32.xlu0 %v297_v22  ;;  %v268_v24 = vpop.xlane.xlu0 %267 }
 0x2b6   :  { %v277_v26 = vmul.f32 0.03125, %v268_v24  ;;  %v300_v27 = vsel %vm253_vm2, %v288_v23, 0.0 }
 0x2b7   :  { %301 = vadd.xlane.f32.xlu1 %v300_v27  ;;  %v271_v36 = vpop.xlane.xlu1 %270 }
 0x2b8   :  { %v3630_v28 = vsub.f32 %v247_v56, %v277_v26  ;;  %v278_v35 = vmul.f32 0.03125, %v271_v36 }
 0x2ba   :  { %v289_v29 = vmul.f32 %v3630_v28, %v3630_v28  ;;  %v3650_v34 = vsub.f32 %v250_v60, %v278_v35 }
 0x2bc   :  { %v303_v30 = vsel %vm253_vm2, %v289_v29, 0.0  ;;  %v290_v38 = vmul.f32 %v3650_v34, %v3650_v34 }
 0x2bd   :  { %304 = vadd.xlane.f32.xlu0 %v303_v30 }
 0x2be   :  { %v306_v39 = vsel %vm253_vm2, %v290_v38, 0.0 }
 0x2c8   :  { %366 = vperm.xlu1 %3168, %v354_v31   ;;  %v397_v31 = vld [vmem:[%s4317_s2 + $0x10] sm:$0xff] }
 0x2cc   :  { %371 = vperm.xlu1 %3168, %v355_v17  }
 0x2d0   :  { %376 = vperm.xlu1 %3168, %v356_v25  }
 0x2d3   :  { %361 = vperm.xlu0 %3167, %v353_v32  }
 0x2d4   :  { %381 = vperm.xlu1 %3168, %v357_v33  }
 0x2f8   :  { %307 = vadd.xlane.f32.xlu1 %v306_v39 }
 0x309   :  { %386 = vperm.xlu1 %3168, %v358_v40  }
 0x33a   :  { %v293_v41 = vpop.xlane.xlu0 %292 }
 0x33b   :  { %v309_v42 = vmul.f32 0.03125, %v293_v41 }
 0x33c   :  { %v296_v44 = vpop.xlane.xlu1 %295 }
 0x33d   :  { %v315_v45 = vadd.f32 1e-05, %v309_v42  ;;  %v310_v46 = vmul.f32 0.03125, %v296_v44 }
 0x33f   :  { %3246 = vrsqrt.f32 %v315_v45  ;;  %v316_v47 = vadd.f32 1e-05, %v310_v46  ;;  %v399_v45 = vld [vmem:[%s4317_s2 + $0x20] sm:$0xff] }
 0x341   :  { %3248 = vrsqrt.f32 %v316_v47 }
 0x342   :  { %v299_v48 = vpop.xlane.xlu0 %298 }
 0x343   :  { %v311_v49 = vmul.f32 0.03125, %v299_v48 }
 0x344   :  { %v302_v50 = vpop.xlane.xlu1 %301 }
 0x345   :  { %v317_v51 = vadd.f32 1e-05, %v311_v49  ;;  %v312_v53 = vmul.f32 0.03125, %v302_v50 }
 0x347   :  { %3250 = vrsqrt.f32 %v317_v51  ;;  %v318_v55 = vadd.f32 1e-05, %v312_v53 }
 0x348   :  { %v367_v4 = vpop.permute.xlu1 %366 }
 0x349   :  { %v3247_v56 = vpop.eup %3246  ;;  %3252 = vrsqrt.f32 %v318_v55 }
 0x34a   :  { %v305_v60 = vpop.xlane.xlu0 %304  ;;  %v327_v61 = vmul.f32 %v3247_v56, %v3610_v6 }
 0x34b   :  { %v3249_v62 = vpop.eup %3248  ;;  %v313_v63 = vmul.f32 0.03125, %v305_v60 }
 0x34c   :  { %v328_v1 = vmul.f32 %v3249_v62, %v3612_v9  ;;  %v337_v7 = vmul.f32 %v336_v57, %v327_v61  ;;  %v395_v9 = vld [vmem:[%s4317_s2] sm:$0xff]  ;;  %v372_v21 = vpop.permute.xlu1 %371  ;;  %v400_v62 = vld [vmem:[%s4317_s2 + $0x28] sm:$0xff] }
 0x34d   :  { %v319_v5 = vadd.f32 1e-05, %v313_v63 }
 0x34e   :  { %v338_v10 = vmul.f32 %v336_v57, %v328_v1  ;;  %v347_v6 = vadd.f32 %v346_v3, %v337_v7 }
 0x34f   :  { %3254 = vrsqrt.f32 %v319_v5 }
 0x350   :  { %v348_v11 = vadd.f32 %v346_v3, %v338_v10  ;;  %v377_v36 = vpop.permute.xlu1 %376 }
 0x351   :  { %v3251_v12 = vpop.eup %3250 }
 0x352   :  { %v390_v14 = vmul.f32 %v367_v4, %v348_v11  ;;  %v329_v15 = vmul.f32 %v3251_v12, %v3620_v18  ;;  %v362_v16 = vpop.permute.xlu0 %361 }
 0x353   :  { %v3253_v19 = vpop.eup %3252  ;;  %v389_v22 = vmul.f32 %v362_v16, %v347_v6 }
 0x354   :  { %v3675_v23 = vadd.f32 %v396_v13, %v390_v14  ;;  %v339_v24 = vmul.f32 %v336_v57, %v329_v15  ;;  %v330_v26 = vmul.f32 %v3253_v19, %v3622_v20  ;;  %v398_v20 = vld [vmem:[%s4317_s2 + $0x18] sm:$0xff]  ;;  %v382_v46 = vpop.permute.xlu1 %381 }
 0x355   :  { %v3678_v27 = vadd.f32 %v395_v9, %v389_v22 }
 0x356   :  { %v349_v29 = vadd.f32 %v346_v3, %v339_v24  ;;  %v340_v30 = vmul.f32 %v336_v57, %v330_v26  ;;  %v410_v18 = vsel %vm253_vm2, %v3675_v23, 0.0 }
 0x357   :  { %411 = vadd.xlane.f32.xlu0 %v410_v18  ;;  %v407_v17 = vsel %vm253_vm2, %v3678_v27, 0.0 }
 0x358   :  { %v391_v25 = vmul.f32 %v372_v21, %v349_v29  ;;  %v350_v32 = vadd.f32 %v346_v3, %v340_v30  ;;  %408 = vadd.xlane.f32.xlu1 %v407_v17 }
 0x359   :  { %v3255_v33 = vpop.eup %3254 }
 0x35a   :  { %v3690_v35 = vadd.f32 %v397_v31, %v391_v25  ;;  %v392_v38 = vmul.f32 %v377_v36, %v350_v32  ;;  %v331_v39 = vmul.f32 %v3255_v33, %v3630_v28  ;;  %v3218_v33 = vld [vmem:[%s4321_s6] sm:$0xff]  }
 0x35b   :  { %2889 = vmatpush3.bf16.msra.mxu1 %v3218_v33 }
 0x35c   :  { %v3693_v40 = vadd.f32 %v398_v20, %v392_v38  ;;  %v341_v41 = vmul.f32 %v336_v57, %v331_v39  ;;  %v413_v42 = vsel %vm253_vm2, %v3690_v35, 0.0  ;;  %v3219_v20 = vld [vmem:[%s4321_s6 + $0x8] sm:$0xff]   ;;  %2890 = vmatprep.subr.bf16.mxu1 %v3417_v43  ;;  %s3420_s6 = smov 96  }
 0x35d   :  { %414 = vadd.xlane.f32.xlu1 %v413_v42 }
 0x35e   :  { %v351_v44 = vadd.f32 %v346_v3, %v341_v41  ;;  %v416_v48 = vsel %vm253_vm2, %v3693_v40, 0.0 }
 0x35f   :  { %2891 = vmatpush3.bf16.msra.mxu1 %v3219_v20 }
 0x360   :  { %v393_v47 = vmul.f32 %v382_v46, %v351_v44 }
 0x361   :  { %417 = vadd.xlane.f32.xlu1 %v416_v48 }
 0x362   :  { %v3702_v49 = vadd.f32 %v399_v45, %v393_v47 }
 0x364   :  { %v419_v28 = vsel %vm253_vm2, %v3702_v49, 0.0 }
 0x365   :  { %420 = vadd.xlane.f32.xlu0 %v419_v28 }
 0x385   :  { %v308_v50 = vpop.xlane.xlu1 %307 }
 0x386   :  { %v314_v51 = vmul.f32 0.03125, %v308_v50 }
 0x388   :  { %v320_v53 = vadd.f32 1e-05, %v314_v51 }
 0x389   :  { %v387_v63 = vpop.permute.xlu1 %386 }
 0x38a   :  { %3256 = vrsqrt.f32 %v320_v53 }
 0x394   :  { %v3257_v55 = vpop.eup %3256 }
 0x395   :  { %v332_v56 = vmul.f32 %v3257_v55, %v3650_v34 }
 0x397   :  { %v342_v60 = vmul.f32 %v336_v57, %v332_v56  ;;  %v487_v56 = vsub.s32 5, %v3572_v59 }
 0x399   :  { %v352_v61 = vadd.f32 %v346_v3, %v342_v60 }
 0x39b   :  { %v394_v1 = vmul.f32 %v387_v63, %v352_v61  ;;  %v497_v61 = vsub.s32 6, %v3572_v59  ;;  %v488_v63 = vrot.slane %v3578_v2, %v487_v56 }
 0x39d   :  { %v3710_v4 = vadd.f32 %v400_v62, %v394_v1 }
 0x39f   :  { %v422_v5 = vsel %vm253_vm2, %v3710_v4, 0.0 }
 0x3a0   :  { %423 = vadd.xlane.f32.xlu1 %v422_v5 }
 0x3e4   :  { %v412_v7 = vpop.xlane.xlu0 %411 }
 0x3e5   :  { %v426_v10 = vmul.f32 0.03125, %v412_v7  ;;  %v409_v11 = vpop.xlane.xlu1 %408 }
 0x3e6   :  { %v425_v12 = vmul.f32 0.03125, %v409_v11 }
 0x3e7   :  { %v432_v34 = vsub.f32 %v3675_v23, %v426_v10  ;;  %v498_v10 = vrot.slane %v3578_v2, %v497_v61 }
 0x3e8   :  { %v431_v57 = vsub.f32 %v3678_v27, %v425_v12 }
 0x3e9   :  { %v438_v3 = vmul.f32 %v432_v34, %v432_v34 }
 0x3ea   :  { %v415_v13 = vpop.xlane.xlu1 %414  ;;  %v437_v6 = vmul.f32 %v431_v57, %v431_v57 }
 0x3eb   :  { %v427_v14 = vmul.f32 0.03125, %v415_v13  ;;  %v446_v15 = vsel %vm253_vm2, %v438_v3, 0.0 }
 0x3ec   :  { %447 = vadd.xlane.f32.xlu1 %v446_v15  ;;  %v443_v9 = vsel %vm253_vm2, %v437_v6, 0.0 }
 0x3ed   :  { %v433_v16 = vsub.f32 %v3690_v35, %v427_v14  ;;  %444 = vadd.xlane.f32.xlu0 %v443_v9 }
 0x3ee   :  { %v418_v19 = vpop.xlane.xlu1 %417 }
 0x3ef   :  { %v428_v21 = vmul.f32 0.03125, %v418_v19  ;;  %v439_v22 = vmul.f32 %v433_v16, %v433_v16 }
 0x3f1   :  { %v434_v24 = vsub.f32 %v3693_v40, %v428_v21  ;;  %v449_v26 = vsel %vm253_vm2, %v439_v22, 0.0 }
 0x3f2   :  { %v421_v29 = vpop.xlane.xlu0 %420  ;;  %450 = vadd.xlane.f32.xlu0 %v449_v26 }
 0x3f3   :  { %v429_v30 = vmul.f32 0.03125, %v421_v29  ;;  %v440_v18 = vmul.f32 %v434_v24, %v434_v24 }
 0x3f5   :  { %v3722_v31 = vsub.f32 %v3702_v49, %v429_v30  ;;  %v452_v17 = vsel %vm253_vm2, %v440_v18, 0.0 }
 0x3f6   :  { %453 = vadd.xlane.f32.xlu1 %v452_v17 }
 0x3f7   :  { %v441_v25 = vmul.f32 %v3722_v31, %v3722_v31 }
 0x3f9   :  { %v455_v32 = vsel %vm253_vm2, %v441_v25, 0.0 }
 0x3fa   :  { %456 = vadd.xlane.f32.xlu0 %v455_v32 }
 0x42d   :  { %v424_v36 = vpop.xlane.xlu1 %423 }
 0x42e   :  { %v430_v38 = vmul.f32 0.03125, %v424_v36 }
 0x430   :  { %v436_v39 = vsub.f32 %v3710_v4, %v430_v38 }
 0x432   :  { %v442_v41 = vmul.f32 %v436_v39, %v436_v39 }
 0x434   :  { %v458_v42 = vsel %vm253_vm2, %v442_v41, 0.0 }
 0x435   :  { %459 = vadd.xlane.f32.xlu1 %v458_v42 }
 0x479   :  { %v448_v44 = vpop.xlane.xlu1 %447 }
 0x47a   :  { %v462_v45 = vmul.f32 0.03125, %v448_v44  ;;  %v445_v46 = vpop.xlane.xlu0 %444 }
 0x47b   :  { %v461_v47 = vmul.f32 0.03125, %v445_v46 }
 0x47c   :  { %v468_v48 = vadd.f32 1e-05, %v462_v45 }
 0x47d   :  { %v467_v28 = vadd.f32 1e-05, %v461_v47 }
 0x47e   :  { %3258 = vrsqrt.f32 %v468_v48 }
 0x47f   :  { %3260 = vrsqrt.f32 %v467_v28  ;;  %v451_v50 = vpop.xlane.xlu0 %450 }
 0x480   :  { %v463_v51 = vmul.f32 0.03125, %v451_v50 }
 0x482   :  { %v469_v53 = vadd.f32 1e-05, %v463_v51 }
 0x483   :  { %v454_v55 = vpop.xlane.xlu1 %453 }
 0x484   :  { %3262 = vrsqrt.f32 %v469_v53  ;;  %v464_v60 = vmul.f32 0.03125, %v454_v55 }
 0x486   :  { %v470_v62 = vadd.f32 1e-05, %v464_v60 }
 0x488   :  { %v3259_v1 = vpop.eup %3258  ;;  %3264 = vrsqrt.f32 %v470_v62 }
 0x489   :  { %v3261_v5 = vpop.eup %3260  ;;  %v480_v7 = vmul.f32 %v3259_v1, %v432_v34 }
 0x48a   :  { %v479_v11 = vmul.f32 %v3261_v5, %v431_v57  ;;  %v457_v57 = vpop.xlane.xlu0 %456 }
 0x48b   :  { %v490_v12 = vmul.f32 %v488_v63, %v480_v7 }
 0x48c   :  { %v489_v3 = vmul.f32 %v488_v63, %v479_v11 }
 0x48d   :  { %v500_v13 = vadd.f32 %v498_v10, %v490_v12 }
 0x48e   :  { %v3263_v6 = vpop.eup %3262  ;;  %v499_v14 = vadd.f32 %v498_v10, %v489_v3 }
 0x48f   :  { %v481_v15 = vmul.f32 %v3263_v6, %v433_v16  ;;  %v465_v16 = vmul.f32 0.03125, %v457_v57 }
 0x490   :  { %v505_v9 = vpack.c.bf16 %v500_v13, %v499_v14 }
 0x491   :  { %v491_v34 = vmul.f32 %v488_v63, %v481_v15  ;;  %v471_v30 = vadd.f32 1e-05, %v465_v16  ;;  %v3790_v16 = vand.u32 127, %v128_v52 }
 0x492   :  { %v3265_v19 = vpop.eup %3264  ;;  %2893 = vmatmul.mubr.msk.bf16.vlgmr.msra.gmra.mrb[0].mxu1 %vm253_vm2, %v505_v9 }
 0x493   :  { %2896 = vmatprep.mubr.msk.bf16.mxu1 %vm3418_vm1, %v3417_v43  ;;  %v482_v21 = vmul.f32 %v3265_v19, %v434_v24  ;;  %v501_v26 = vadd.f32 %v498_v10, %v491_v34  ;;  %3266 = vrsqrt.f32 %v471_v30  ;;  %vm592_vm4 = vcmp.lt.s32.totalorder %v3790_v16, 17 }
 0x495   :  { %v492_v22 = vmul.f32 %v488_v63, %v482_v21 }
 0x497   :  { %v502_v29 = vadd.f32 %v498_v10, %v492_v22 }
 0x499   :  { %v506_v2 = vpack.c.bf16 %v502_v29, %v501_v26 }
 0x49b   :  { %2897 = vmatmul.mubr.msk.bf16.gmra.mrb[4].mxu1 %vm253_vm2, %v506_v2 }
 0x49c   :  { %2900 = vmatprep.mubr.msk.bf16.mxu1 %vm3418_vm1, %v3417_v43 }
 0x49d   :  { %v3267_v32 = vpop.eup %3266 }
 0x49e   :  { %v483_v24 = vmul.f32 %v3267_v32, %v3722_v31 }
 0x4a0   :  { %v493_v36 = vmul.f32 %v488_v63, %v483_v24 }
 0x4a2   :  { %v503_v41 = vadd.f32 %v498_v10, %v493_v36 }
 0x4c2   :  { %v460_v18 = vpop.xlane.xlu1 %459 }
 0x4c3   :  { %v466_v17 = vmul.f32 0.03125, %v460_v18 }
 0x4c5   :  { %v472_v25 = vadd.f32 1e-05, %v466_v17 }
 0x4c7   :  { %3268 = vrsqrt.f32 %v472_v25 }
 0x4d1   :  { %v3269_v33 = vpop.eup %3268 }
 0x4d2   :  { %v484_v20 = vmul.f32 %v3269_v33, %v436_v39 }
 0x4d4   :  { %v494_v38 = vmul.f32 %v488_v63, %v484_v20 }
 0x4d6   :  { %v504_v42 = vadd.f32 %v498_v10, %v494_v38 }
 0x4d8   :  { %v507_v44 = vpack.c.bf16 %v504_v42, %v503_v41 }
 0x4da   :  { %2901 = vmatmul.mubr.msk.bf16.gmra.mrb[8].mxu1 %vm253_vm2, %v507_v44 }
 0x565   :  { %v567_v45 = vpop.f32.mrb[0].mxu1 }
 0x566   :  { %v2894_v46 = vpop.f32.mrb[1].mxu1  ;;  %v593_v48 = vmul.f32 0.35355338, %v567_v45 }
 0x567   :  { %v570_v47 = vpop.f32.mrb[2].mxu1 }
 0x568   :  { %v594_v28 = vmul.f32 0.35355338, %v570_v47  ;;  %v3753_v50 = vpack.c.bf16 %v570_v47, %v567_v45  ;;  %v2895_v51 = vpop.f32.mrb[3].mxu1 }
 0x56a   :  { %v3755_v53 = vpack.c.bf16 %v594_v28, %v593_v48  ;;  %609 = vrot.lane.b32.xlu0 %v3753_v50, %s3420_s6 }
 0x56c   :  { %2908 = vmatprep.mubr.msk.bf16.mxu1 %vm613_vm3, %v3755_v53 }
 0x56e   :  { %v575_v31 = vpop.f32.mrb[4].mxu1 }
 0x56f   :  { %v3760_v39 = vpack.c.bf16 %v575_v31, %v575_v31  ;;  %v2898_v55 = vpop.f32.mrb[5].mxu1  ;;  %v595_v19 = vmul.f32 0.35355338, %v575_v31 }
 0x570   :  { %v578_v60 = vpop.f32.mrb[6].mxu1 }
 0x571   :  { %611 = vrot.lane.b32.xlu1 %v3760_v39, %s3420_s6  ;;  %v2899_v62 = vpop.f32.mrb[7].mxu1  ;;  %v596_v1 = vmul.f32 0.35355338, %v578_v60  ;;  %v3777_v21 = vpack.c.bf16 %v595_v19, %v595_v19 }
 0x5ad   :  { %v583_v63 = vpop.f32.mrb[8].mxu1 }
 0x5ae   :  { %v597_v5 = vmul.f32 0.35355338, %v583_v63  ;;  %v3763_v7 = vpack.c.bf16 %v583_v63, %v578_v60  ;;  %v2902_v10 = vpop.f32.mrb[9].mxu1 }
 0x5af   :  { %v586_v11 = vpop.f32.mrb[10].mxu1 }
 0x5b0   :  { %v3765_v12 = vpack.c.bf16 %v597_v5, %v596_v1  ;;  %v3767_v3 = vpack.c.bf16 %v586_v11, %v586_v11  ;;  %676 = vrot.lane.b32.xlu1 %v3763_v7, %s3420_s6  ;;  %v2903_v13 = vpop.f32.mrb[11].mxu1  ;;  %v598_v2 = vmul.f32 0.35355338, %v586_v11 }
 0x5b2   :  { %2916 = vmatprep.mubr.msk.bf16.mxu0 %vm613_vm3, %v3765_v12  ;;  %678 = vrot.lane.b32.xlu0 %v3767_v3, %s3420_s6  ;;  %v3785_v57 = vpack.c.bf16 %v598_v2, %v598_v2 }
 0x5dc   :  { %v610_v6 = vpop.permute.xlu0 %609 }
 0x5dd   :  { %3124 = vmatprep.subr.msk.bf16.mxu1 %vm613_vm3, %v610_v6  ;;  %v621_v14 = vsel %vm613_vm3, %v610_v6, 0 }
 0x5de   :  { %2905 = vmatpush3.bf16.xpose.msra.mxu1 %v621_v14 }
 0x5e3   :  { %v612_v15 = vpop.permute.xlu1 %611 }
 0x5e4   :  { %3125 = vmatprep.subr.msk.bf16.mxu1 %vm613_vm3, %v612_v15  ;;  %v624_v9 = vsel %vm613_vm3, %v612_v15, 0 }
 0x5e6   :  { %2907 = vmatpush3.bf16.xpose.msra.mxu1 %v624_v9 }
 0x5ed   :  { %2909 = vmatmul.mubr.msk.bf16.vlgmr.msra.gmra.mrb[12].mxu1 %vm613_vm3, %v3777_v21 }
 0x622   :  { %v677_v34 = vpop.permute.xlu1 %676 }
 0x623   :  { %3126 = vmatprep.subr.msk.bf16.mxu0 %vm613_vm3, %v677_v34  ;;  %v687_v22 = vsel %vm613_vm3, %v677_v34, 0 }
 0x624   :  { %v679_v26 = vpop.permute.xlu0 %678  ;;  %2913 = vmatpush3.bf16.xpose.msra.mxu0 %v687_v22 }
 0x625   :  { %3127 = vmatprep.subr.msk.bf16.mxu0 %vm613_vm3, %v679_v26  ;;  %v690_v29 = vsel %vm613_vm3, %v679_v26, 0 }
 0x62c   :  { %2915 = vmatpush3.bf16.xpose.msra.mxu0 %v690_v29 }
 0x633   :  { %2917 = vmatmul.mubr.msk.bf16.vlgmr.msra.gmra.mrb[12].mxu0 %vm613_vm3, %v3785_v57 }
 0x6c0   :  { %v2910_v30 = vpop.f32.mrb[12].mxu1 }
 0x6c1   :  { %v744_v18 = vsel %vm592_vm4, %v2910_v30, -1e+30  ;;  %v660_v17 = vpop.f32.mrb[13].mxu1 }
 0x6c2   :  { %v742_v25 = vsel %vm592_vm4, %v660_v17, -1e+30  ;;  %v2911_v32 = vpop.f32.mrb[14].mxu1  ;;  %v755_v24 = vsel %vm748_vm5, %v744_v18, -inf }
 0x6c3   :  { %756 = vmax.xlane.f32.xlu0 %v755_v24  ;;  %v663_v33 = vpop.f32.mrb[15].mxu1  ;;  %v749_v20 = vsel %vm748_vm5, %v742_v25, -inf }
 0x6c4   :  { %v743_v52 = vsel %vm592_vm4, %v663_v33, -1e+30  ;;  %750 = vmax.xlane.f32.xlu1 %v749_v20 }
 0x6c5   :  { %v752_v36 = vsel %vm748_vm5, %v743_v52, -inf }
 0x6c7   :  { %753 = vmax.xlane.f32.xlu0 %v752_v36 }
 0x706   :  { %v2918_v38 = vpop.f32.mrb[12].mxu0 }
 0x707   :  { %v726_v41 = vpop.f32.mrb[13].mxu0  ;;  %v747_v47 = vsel %vm592_vm4, %v2918_v38, -1e+30 }
 0x708   :  { %v745_v42 = vsel %vm592_vm4, %v726_v41, -1e+30  ;;  %v2919_v44 = vpop.f32.mrb[14].mxu0  ;;  %v764_v51 = vsel %vm748_vm5, %v747_v47, -inf }
 0x709   :  { %v729_v45 = vpop.f32.mrb[15].mxu0  ;;  %v758_v46 = vsel %vm748_vm5, %v745_v42, -inf }
 0x70a   :  { %v746_v48 = vsel %vm592_vm4, %v729_v45, -1e+30  ;;  %759 = vmax.xlane.f32.xlu1 %v758_v46 }
 0x70b   :  { %v761_v28 = vsel %vm748_vm5, %v746_v48, -inf }
 0x70c   :  { %762 = vmax.xlane.f32.xlu0 %v761_v28 }
 0x70e   :  { %765 = vmax.xlane.f32.xlu1 %v764_v51 }
 0x71f   :  { %821 = vrot.lane.b32.xlu1 %v3760_v39, %s3421_s23 }
 0x722   :  { %819 = vrot.lane.b32.xlu0 %v3753_v50, %s3421_s23 }
 0x723   :  { %882 = vrot.lane.b32.xlu1 %v3763_v7, %s3421_s23 }
 0x727   :  { %884 = vrot.lane.b32.xlu1 %v3767_v3, %s3421_s23 }
 0x750   :  { %v757_v31 = vpop.xlane.xlu0 %756 }
 0x751   :  { %v769_v55 = vsub.f32 %v744_v18, %v757_v31  ;;  %v751_v60 = vpop.xlane.xlu1 %750 }
 0x752   :  { %v767_v62 = vsub.f32 %v742_v25, %v751_v60 }
 0x753   :  { %v777_v63 = vmul.f32 1.442695, %v769_v55 }
 0x754   :  { %v773_v1 = vmul.f32 1.442695, %v767_v62  ;;  %v754_v5 = vpop.xlane.xlu0 %753 }
 0x755   :  { %3270 = vpow2.f32 %v777_v63  ;;  %v768_v10 = vsub.f32 %v743_v52, %v754_v5 }
 0x756   :  { %3272 = vpow2.f32 %v773_v1 }
 0x757   :  { %v775_v11 = vmul.f32 1.442695, %v768_v10 }
 0x759   :  { %3274 = vpow2.f32 %v775_v11 }
 0x75f   :  { %v3815_v13 = vpop.eup %3270 }
 0x760   :  { %v791_v6 = vsel %vm748_vm5, %v3815_v13, 0.0  ;;  %v3819_v14 = vpop.eup %3272 }
 0x761   :  { %792 = vadd.xlane.f32.xlu0 %v791_v6  ;;  %v785_v19 = vsel %vm748_vm5, %v3819_v14, 0.0 }
 0x763   :  { %v3275_v15 = vpop.eup %3274 }
 0x764   :  { %v788_v9 = vsel %vm748_vm5, %v3275_v15, 0.0 }
 0x765   :  { %789 = vadd.xlane.f32.xlu1 %v788_v9  ;;  %786 = vadd.xlane.f32.xlu0 %v785_v19 }
 0x77b   :  { %950 = vrot.lane.b32.xlu0 %v3753_v50, %s3422_s24 }
 0x797   :  { %v760_v34 = vpop.xlane.xlu1 %759 }
 0x798   :  { %v770_v26 = vsub.f32 %v745_v42, %v760_v34 }
 0x799   :  { %v763_v22 = vpop.xlane.xlu0 %762 }
 0x79a   :  { %v771_v29 = vsub.f32 %v746_v48, %v763_v22  ;;  %v779_v25 = vmul.f32 1.442695, %v770_v26 }
 0x79b   :  { %v766_v2 = vpop.xlane.xlu1 %765 }
 0x79c   :  { %v781_v30 = vmul.f32 1.442695, %v771_v29  ;;  %v772_v18 = vsub.f32 %v747_v47, %v766_v2 }
 0x79d   :  { %v820_v17 = vpop.permute.xlu0 %819 }
 0x79e   :  { %3276 = vpow2.f32 %v781_v30  ;;  %v783_v32 = vmul.f32 1.442695, %v772_v18  ;;  %2920 = vmatprep.subr.bf16.mxu1 %v820_v17 }
 0x79f   :  { %v822_v24 = vpop.permute.xlu1 %821  ;;  %2921 = vmatpush3.bf16.msra.mxu1 %v820_v17 }
 0x7a0   :  { %3278 = vpow2.f32 %v783_v32  ;;  %3128 = vmatprep.subr.msk.bf16.mxu1 %vm830_vm6, %v822_v24  ;;  %v832_v33 = vsel %vm830_vm6, %v822_v24, 0 }
 0x7a1   :  { %3280 = vpow2.f32 %v779_v25 }
 0x7a3   :  { %v883_v20 = vpop.permute.xlu1 %882  ;;  %2923 = vmatpush3.bf16.msra.mxu1 %v832_v33 }
 0x7a4   :  { %2928 = vmatprep.subr.bf16.mxu0 %v883_v20 }
 0x7a5   :  { %2929 = vmatpush3.bf16.msra.mxu0 %v883_v20 }
 0x7a7   :  { %v885_v52 = vpop.permute.xlu1 %884 }
 0x7a8   :  { %v3277_v36 = vpop.eup %3276  ;;  %3129 = vmatprep.subr.msk.bf16.mxu0 %vm830_vm6, %v885_v52  ;;  %v894_v38 = vsel %vm830_vm6, %v885_v52, 0 }
 0x7a9   :  { %2931 = vmatpush3.bf16.msra.mxu0 %v894_v38  ;;  %v797_v41 = vsel %vm748_vm5, %v3277_v36, 0.0 }
 0x7aa   :  { %v3279_v42 = vpop.eup %3278  ;;  %798 = vadd.xlane.f32.xlu0 %v797_v41 }
 0x7ab   :  { %v800_v44 = vsel %vm748_vm5, %v3279_v42, 0.0  ;;  %v3281_v45 = vpop.eup %3280 }
 0x7ac   :  { %801 = vadd.xlane.f32.xlu1 %v800_v44  ;;  %v794_v46 = vsel %vm748_vm5, %v3281_v45, 0.0 }
 0x7b0   :  { %795 = vadd.xlane.f32.xlu1 %v794_v46 }
 0x7c0   :  { %952 = vrot.lane.b32.xlu0 %v3760_v39, %s3422_s24 }
 0x7c1   :  { %1020 = vrot.lane.b32.xlu1 %v3763_v7, %s3422_s24 }
 0x7c4   :  { %946 = vrot.lane.b32.xlu0 %v3755_v53, %s3423_s25 }
 0x7c5   :  { %948 = vrot.lane.b32.xlu1 %v3777_v21, %s3423_s25 }
 0x7c8   :  { %1022 = vrot.lane.b32.xlu0 %v3767_v3, %s3422_s24 }
 0x7c9   :  { %1016 = vrot.lane.b32.xlu1 %v3765_v12, %s3423_s25 }
 0x7cc   :  { %1018 = vrot.lane.b32.xlu0 %v3785_v57, %s3423_s25 }
 0x7ee   :  { %v793_v47 = vpop.xlane.xlu0 %792 }
 0x7ef   :  { %3282 = vrcp.f32 %v793_v47 }
 0x7f2   :  { %v790_v48 = vpop.xlane.xlu1 %789  ;;  %v787_v28 = vpop.xlane.xlu0 %786 }
 0x7f3   :  { %3284 = vrcp.f32 %v790_v48 }
 0x7f4   :  { %3286 = vrcp.f32 %v787_v28 }
 0x7f6   :  { %v951_v51 = vpop.permute.xlu0 %950 }
 0x7f7   :  { %3130 = vmatprep.subr.msk.bf16.mxu1 %vm613_vm3, %v951_v51  ;;  %v961_v11 = vsel %vm613_vm3, %v951_v51, 0 }
 0x7f9   :  { %v3283_v31 = vpop.eup %3282 }
 0x7fa   :  { %v811_v63 = vmul.f32 %v3283_v31, %v3815_v13 }
 0x7fc   :  { %v816_v10 = vpack.c.bf16 %v811_v63, %v811_v63 }
 0x7fd   :  { %v3285_v55 = vpop.eup %3284 }
 0x7fe   :  { %v3287_v60 = vpop.eup %3286  ;;  %v810_v62 = vmul.f32 %v3285_v55, %v3275_v15 }
 0x7ff   :  { %v809_v1 = vmul.f32 %v3287_v60, %v3819_v14 }
 0x801   :  { %v815_v5 = vpack.c.bf16 %v810_v62, %v809_v1 }
 0x803   :  { %2924 = vmatprep.mubr.msk.bf16.mxu1 %vm748_vm5, %v815_v5 }
 0x804   :  { %2925 = vmatmul.mubr.msk.bf16.vlgmr.msra.gmra.mrb[16].mxu1 %vm748_vm5, %v816_v10 }
 0x805   :  { %2937 = vmatpush3.bf16.xpose.msra.mxu1 %v961_v11 }
 0x837   :  { %v799_v6 = vpop.xlane.xlu0 %798 }
 0x839   :  { %v802_v9 = vpop.xlane.xlu1 %801 }
 0x83a   :  { %3288 = vrcp.f32 %v802_v9 }
 0x83b   :  { %v953_v19 = vpop.permute.xlu0 %952  ;;  %3290 = vrcp.f32 %v799_v6 }
 0x83c   :  { %v964_v15 = vsel %vm613_vm3, %v953_v19, 0  ;;  %3131 = vmatprep.subr.msk.bf16.mxu1 %vm613_vm3, %v953_v19 }
 0x83d   :  { %v796_v13 = vpop.xlane.xlu1 %795  ;;  %2939 = vmatpush3.bf16.xpose.msra.mxu1 %v964_v15 }
 0x83e   :  { %3292 = vrcp.f32 %v796_v13 }
 0x83f   :  { %v947_v14 = vpop.permute.xlu0 %946 }
 0x840   :  { %2940 = vmatprep.mubr.msk.bf16.mxu1 %vm613_vm3, %v947_v14 }
 0x841   :  { %v1021_v34 = vpop.permute.xlu1 %1020 }
 0x842   :  { %3132 = vmatprep.subr.msk.bf16.mxu0 %vm613_vm3, %v1021_v34  ;;  %v1031_v24 = vsel %vm613_vm3, %v1021_v34, 0 }
 0x843   :  { %v1023_v20 = vpop.permute.xlu0 %1022 }
 0x844   :  { %v3289_v22 = vpop.eup %3288  ;;  %v1034_v52 = vsel %vm613_vm3, %v1023_v20, 0 }
 0x845   :  { %v949_v26 = vpop.permute.xlu1 %948  ;;  %v3291_v29 = vpop.eup %3290  ;;  %v814_v30 = vmul.f32 %v3289_v22, %v3279_v42 }
 0x846   :  { %2941 = vmatmul.mubr.msk.bf16.vlgmr.msra.gmra.mrb[20].mxu1 %vm613_vm3, %v949_v26  ;;  %v813_v17 = vmul.f32 %v3291_v29, %v3277_v36 }
 0x847   :  { %v818_v32 = vpack.c.bf16 %v814_v30, %v814_v30  ;;  %v1019_v38 = vpop.permute.xlu0 %1018 }
 0x848   :  { %v3293_v2 = vpop.eup %3292 }
 0x849   :  { %v812_v18 = vmul.f32 %v3293_v2, %v3281_v45  ;;  %v1017_v33 = vpop.permute.xlu1 %1016 }
 0x84b   :  { %v817_v25 = vpack.c.bf16 %v813_v17, %v812_v18 }
 0x84d   :  { %2932 = vmatprep.mubr.msk.bf16.mxu0 %vm748_vm5, %v817_v25 }
 0x84e   :  { %2933 = vmatmul.mubr.msk.bf16.vlgmr.msra.gmra.mrb[16].mxu0 %vm748_vm5, %v818_v32 }
 0x84f   :  { %2945 = vmatpush3.bf16.xpose.msra.mxu0 %v1031_v24  ;;  %2948 = vmatprep.mubr.msk.bf16.mxu0 %vm613_vm3, %v1017_v33 }
 0x850   :  { %3133 = vmatprep.subr.msk.bf16.mxu0 %vm613_vm3, %v1023_v20 }
 0x857   :  { %2947 = vmatpush3.bf16.xpose.msra.mxu0 %v1034_v52 }
 0x85e   :  { %2949 = vmatmul.mubr.msk.bf16.vlgmr.msra.gmra.mrb[20].mxu0 %vm613_vm3, %v1019_v38 }
 0x8d7   :  { %v3861_v36 = vpop.f32.mrb[16].mxu1 }
 0x8d8   :  { %v3863_v41 = vpop.f32.mrb[17].mxu1 }
 0x8d9   :  { %v2927_v42 = vpop.f32.mrb[18].mxu1 }
 0x8da   :  { %v3865_v44 = vpop.f32.mrb[19].mxu1 }
 0x919   :  { %v2942_v45 = vpop.f32.mrb[20].mxu1 }
 0x91a   :  { %v1086_v46 = vsel %vm592_vm4, %v2942_v45, -1e+30  ;;  %v1000_v47 = vpop.f32.mrb[21].mxu1 }
 0x91b   :  { %v1084_v48 = vsel %vm592_vm4, %v1000_v47, -1e+30  ;;  %v2943_v28 = vpop.f32.mrb[22].mxu1  ;;  %v1096_v51 = vsel %vm748_vm5, %v1086_v46, -inf }
 0x91c   :  { %1097 = vmax.xlane.f32.xlu0 %v1096_v51  ;;  %v1003_v31 = vpop.f32.mrb[23].mxu1  ;;  %v1090_v55 = vsel %vm748_vm5, %v1084_v48, -inf }
 0x91d   :  { %v1085_v60 = vsel %vm592_vm4, %v1003_v31, -1e+30  ;;  %1091 = vmax.xlane.f32.xlu1 %v1090_v55 }
 0x91e   :  { %v1093_v62 = vsel %vm748_vm5, %v1085_v60, -inf }
 0x920   :  { %1094 = vmax.xlane.f32.xlu0 %v1093_v62 }
 0x921   :  { %v3876_v63 = vpop.f32.mrb[16].mxu0 }
 0x922   :  { %v3878_v1 = vpop.f32.mrb[17].mxu0 }
 0x923   :  { %v2935_v5 = vpop.f32.mrb[18].mxu0 }
 0x924   :  { %v3880_v10 = vpop.f32.mrb[19].mxu0 }
 0x931   :  { %v2950_v11 = vpop.f32.mrb[20].mxu0 }
 0x932   :  { %v1070_v6 = vpop.f32.mrb[21].mxu0  ;;  %v1089_v14 = vsel %vm592_vm4, %v2950_v11, -1e+30 }
 0x933   :  { %v1087_v9 = vsel %vm592_vm4, %v1070_v6, -1e+30  ;;  %v2951_v19 = vpop.f32.mrb[22].mxu0  ;;  %v1105_v26 = vsel %vm748_vm5, %v1089_v14, -inf }
 0x934   :  { %v1073_v15 = vpop.f32.mrb[23].mxu0  ;;  %v1099_v13 = vsel %vm748_vm5, %v1087_v9, -inf }
 0x935   :  { %v3889_v34 = vsel %vm592_vm4, %v1073_v15, -1e+30  ;;  %1100 = vmax.xlane.f32.xlu1 %v1099_v13 }
 0x936   :  { %v1102_v22 = vsel %vm748_vm5, %v3889_v34, -inf }
 0x937   :  { %1103 = vmax.xlane.f32.xlu0 %v1102_v22 }
 0x939   :  { %1106 = vmax.xlane.f32.xlu1 %v1105_v26 }
 0x94a   :  { %1162 = vrot.lane.b32.xlu1 %v3760_v39, %s3424_s26 }
 0x94d   :  { %1160 = vrot.lane.b32.xlu0 %v3753_v50, %s3424_s26 }
 0x94e   :  { %1222 = vrot.lane.b32.xlu1 %v3763_v7, %s3424_s26 }
 0x952   :  { %1224 = vrot.lane.b32.xlu1 %v3767_v3, %s3424_s26 }
 0x9a9   :  { %v1098_v29 = vpop.xlane.xlu0 %1097 }
 0x9aa   :  { %v1110_v2 = vsub.f32 %v1086_v46, %v1098_v29  ;;  %v1092_v30 = vpop.xlane.xlu1 %1091 }
 0x9ab   :  { %v1108_v18 = vsub.f32 %v1084_v48, %v1092_v30 }
 0x9ac   :  { %v1118_v17 = vmul.f32 1.442695, %v1110_v2 }
 0x9ad   :  { %v1114_v25 = vmul.f32 1.442695, %v1108_v18  ;;  %v1095_v32 = vpop.xlane.xlu0 %1094 }
 0x9ae   :  { %3294 = vpow2.f32 %v1118_v17  ;;  %v1109_v24 = vsub.f32 %v1085_v60, %v1095_v32 }
 0x9af   :  { %3296 = vpow2.f32 %v1114_v25 }
 0x9b0   :  { %v1116_v33 = vmul.f32 1.442695, %v1109_v24 }
 0x9b2   :  { %3298 = vpow2.f32 %v1116_v33 }
 0x9b8   :  { %v3898_v20 = vpop.eup %3294 }
 0x9b9   :  { %v1132_v52 = vsel %vm748_vm5, %v3898_v20, 0.0  ;;  %v3902_v38 = vpop.eup %3296 }
 0x9ba   :  { %1133 = vadd.xlane.f32.xlu0 %v1132_v52  ;;  %v1126_v45 = vsel %vm748_vm5, %v3902_v38, 0.0 }
 0x9bc   :  { %v3299_v42 = vpop.eup %3298 }
 0x9bd   :  { %v1129_v46 = vsel %vm748_vm5, %v3299_v42, 0.0 }
 0x9be   :  { %1127 = vadd.xlane.f32.xlu0 %v1126_v45  ;;  %1130 = vadd.xlane.f32.xlu1 %v1129_v46 }
 0x9c2   :  { %v1101_v47 = vpop.xlane.xlu1 %1100 }
 0x9c3   :  { %v1111_v28 = vsub.f32 %v1087_v9, %v1101_v47 }
 0x9c4   :  { %v1104_v48 = vpop.xlane.xlu0 %1103 }
 0x9c5   :  { %v1120_v60 = vmul.f32 1.442695, %v1111_v28  ;;  %v1112_v26 = vsub.f32 %v3889_v34, %v1104_v48 }
 0x9c6   :  { %v1107_v51 = vpop.xlane.xlu1 %1106 }
 0x9c7   :  { %v1113_v31 = vsub.f32 %v1089_v14, %v1107_v51  ;;  %v1122_v29 = vmul.f32 1.442695, %v1112_v26 }
 0x9c8   :  { %v1161_v55 = vpop.permute.xlu0 %1160 }
 0x9c9   :  { %v1124_v62 = vmul.f32 1.442695, %v1113_v31  ;;  %2952 = vmatprep.subr.bf16.mxu1 %v1161_v55 }
 0x9ca   :  { %v1163_v5 = vpop.permute.xlu1 %1162  ;;  %2953 = vmatpush3.bf16.msra.mxu1 %v1161_v55 }
 0x9cb   :  { %3300 = vpow2.f32 %v1124_v62  ;;  %3134 = vmatprep.subr.msk.bf16.mxu1 %vm830_vm6, %v1163_v5  ;;  %v1172_v11 = vsel %vm830_vm6, %v1163_v5, 0 }
 0x9cc   :  { %3302 = vpow2.f32 %v1120_v60 }
 0x9cd   :  { %3304 = vpow2.f32 %v1122_v29 }
 0x9ce   :  { %v1223_v6 = vpop.permute.xlu1 %1222  ;;  %2955 = vmatpush3.bf16.msra.mxu1 %v1172_v11 }
 0x9cf   :  { %2960 = vmatprep.subr.bf16.mxu0 %v1223_v6 }
 0x9d0   :  { %2961 = vmatpush3.bf16.msra.mxu0 %v1223_v6 }
 0x9d2   :  { %v1225_v19 = vpop.permute.xlu1 %1224 }
 0x9d3   :  { %v1234_v9 = vsel %vm830_vm6, %v1225_v19, 0  ;;  %3135 = vmatprep.subr.msk.bf16.mxu0 %vm830_vm6, %v1225_v19 }
 0x9d4   :  { %2963 = vmatpush3.bf16.msra.mxu0 %v1234_v9  ;;  %1288 = vrot.lane.b32.xlu0 %v3753_v50, %s3425_s27 }
 0x9d5   :  { %v3301_v15 = vpop.eup %3300 }
 0x9d6   :  { %v1141_v13 = vsel %vm748_vm5, %v3301_v15, 0.0  ;;  %v3303_v14 = vpop.eup %3302 }
 0x9d7   :  { %1142 = vadd.xlane.f32.xlu1 %v1141_v13  ;;  %v1135_v22 = vsel %vm748_vm5, %v3303_v14, 0.0  ;;  %v3305_v2 = vpop.eup %3304 }
 0x9d8   :  { %v1138_v30 = vsel %vm748_vm5, %v3305_v2, 0.0 }
 0x9db   :  { %1136 = vadd.xlane.f32.xlu1 %v1135_v22 }
 0x9ec   :  { %1356 = vrot.lane.b32.xlu1 %v3763_v7, %s3425_s27 }
 0x9f0   :  { %1286 = vrot.lane.b32.xlu1 %v3777_v21, %s3426_s28 }
 0x9f3   :  { %1139 = vadd.xlane.f32.xlu0 %v1138_v30 }
 0x9f4   :  { %1352 = vrot.lane.b32.xlu1 %v3765_v12, %s3426_s28 }
 0xa09   :  { %1290 = vrot.lane.b32.xlu0 %v3760_v39, %s3425_s27 }
 0xa0d   :  { %1284 = vrot.lane.b32.xlu0 %v3755_v53, %s3426_s28 }
 0xa11   :  { %1358 = vrot.lane.b32.xlu0 %v3767_v3, %s3425_s27 }
 0xa15   :  { %1354 = vrot.lane.b32.xlu0 %v3785_v57, %s3426_s28 }
 0xa47   :  { %v1134_v34 = vpop.xlane.xlu0 %1133 }
 0xa48   :  { %3306 = vrcp.f32 %v1134_v34 }
 0xa4b   :  { %v1131_v18 = vpop.xlane.xlu1 %1130  ;;  %v1128_v17 = vpop.xlane.xlu0 %1127 }
 0xa4c   :  { %3308 = vrcp.f32 %v1131_v18 }
 0xa4d   :  { %3310 = vrcp.f32 %v1128_v17 }
 0xa4f   :  { %v1289_v25 = vpop.permute.xlu0 %1288 }
 0xa50   :  { %3136 = vmatprep.subr.msk.bf16.mxu1 %vm613_vm3, %v1289_v25  ;;  %v1299_v28 = vsel %vm613_vm3, %v1289_v25, 0 }
 0xa52   :  { %v3307_v32 = vpop.eup %3306 }
 0xa53   :  { %v1152_v52 = vmul.f32 %v3307_v32, %v3898_v20 }
 0xa55   :  { %v1157_v48 = vpack.c.bf16 %v1152_v52, %v1152_v52 }
 0xa56   :  { %v3309_v24 = vpop.eup %3308 }
 0xa57   :  { %v3311_v33 = vpop.eup %3310  ;;  %v1151_v45 = vmul.f32 %v3309_v24, %v3299_v42 }
 0xa58   :  { %v1150_v46 = vmul.f32 %v3311_v33, %v3902_v38 }
 0xa5a   :  { %v1156_v47 = vpack.c.bf16 %v1151_v45, %v1150_v46 }
 0xa5c   :  { %2956 = vmatprep.mubr.msk.bf16.mxu1 %vm748_vm5, %v1156_v47 }
 0xa5d   :  { %2957 = vmatmul.mubr.msk.bf16.vlgmr.msra.gmra.mrb[24].mxu1 %vm748_vm5, %v1157_v48 }
 0xa5e   :  { %2969 = vmatpush3.bf16.xpose.msra.mxu1 %v1299_v28 }
 0xa64   :  { %v1143_v51 = vpop.xlane.xlu1 %1142 }
 0xa65   :  { %3312 = vrcp.f32 %v1143_v51 }
 0xa68   :  { %v1137_v31 = vpop.xlane.xlu1 %1136 }
 0xa69   :  { %3314 = vrcp.f32 %v1137_v31 }
 0xa6c   :  { %v1357_v55 = vpop.permute.xlu1 %1356 }
 0xa6d   :  { %3138 = vmatprep.subr.msk.bf16.mxu0 %vm613_vm3, %v1357_v55  ;;  %v1367_v29 = vsel %vm613_vm3, %v1357_v55, 0 }
 0xa6f   :  { %v3313_v60 = vpop.eup %3312 }
 0xa70   :  { %v1155_v6 = vmul.f32 %v3313_v60, %v3301_v15  ;;  %v1287_v19 = vpop.permute.xlu1 %1286 }
 0xa72   :  { %v1159_v26 = vpack.c.bf16 %v1155_v6, %v1155_v6 }
 0xa73   :  { %v3315_v5 = vpop.eup %3314 }
 0xa74   :  { %v1153_v9 = vmul.f32 %v3315_v5, %v3303_v14  ;;  %v1353_v30 = vpop.permute.xlu1 %1352 }
 0xa80   :  { %v1140_v20 = vpop.xlane.xlu0 %1139 }
 0xa81   :  { %3316 = vrcp.f32 %v1140_v20 }
 0xa84   :  { %v1291_v42 = vpop.permute.xlu0 %1290 }
 0xa85   :  { %v1302_v38 = vsel %vm613_vm3, %v1291_v42, 0  ;;  %3137 = vmatprep.subr.msk.bf16.mxu1 %vm613_vm3, %v1291_v42 }
 0xa86   :  { %2971 = vmatpush3.bf16.xpose.msra.mxu1 %v1302_v38 }
 0xa88   :  { %v1285_v62 = vpop.permute.xlu0 %1284 }
 0xa89   :  { %2972 = vmatprep.mubr.msk.bf16.mxu1 %vm613_vm3, %v1285_v62 }
 0xa8b   :  { %v3317_v11 = vpop.eup %3316 }
 0xa8c   :  { %v1154_v13 = vmul.f32 %v3317_v11, %v3305_v2  ;;  %v1359_v34 = vpop.permute.xlu0 %1358 }
 0xa8d   :  { %2973 = vmatmul.mubr.msk.bf16.vlgmr.msra.gmra.mrb[28].mxu1 %vm613_vm3, %v1287_v19  ;;  %v1370_v15 = vsel %vm613_vm3, %v1359_v34, 0 }
 0xa8e   :  { %v1158_v22 = vpack.c.bf16 %v1154_v13, %v1153_v9 }
 0xa90   :  { %2964 = vmatprep.mubr.msk.bf16.mxu0 %vm748_vm5, %v1158_v22  ;;  %v1355_v14 = vpop.permute.xlu0 %1354 }
 0xa91   :  { %2965 = vmatmul.mubr.msk.bf16.vlgmr.msra.gmra.mrb[24].mxu0 %vm748_vm5, %v1159_v26 }
 0xa92   :  { %2977 = vmatpush3.bf16.xpose.msra.mxu0 %v1367_v29  ;;  %2980 = vmatprep.mubr.msk.bf16.mxu0 %vm613_vm3, %v1353_v30 }
 0xa93   :  { %3139 = vmatprep.subr.msk.bf16.mxu0 %vm613_vm3, %v1359_v34 }
 0xa9a   :  { %2979 = vmatpush3.bf16.xpose.msra.mxu0 %v1370_v15 }
 0xaa1   :  { %2981 = vmatmul.mubr.msk.bf16.vlgmr.msra.gmra.mrb[28].mxu0 %vm613_vm3, %v1355_v14 }
 0xb30   :  { %v3941_v2 = vpop.f32.mrb[24].mxu1 }
 0xb31   :  { %v3943_v18 = vpop.f32.mrb[25].mxu1 }
 0xb32   :  { %v2959_v17 = vpop.f32.mrb[26].mxu1 }
 0xb33   :  { %v3945_v25 = vpop.f32.mrb[27].mxu1 }
 0xb34   :  { %v3169_v32 = vpack.i.bf16 %v3945_v25, %v3943_v18 }
 0xb60   :  { %v2974_v24 = vpop.f32.mrb[28].mxu1 }
 0xb61   :  { %v1422_v33 = vsel %vm592_vm4, %v2974_v24, -1e+30  ;;  %v1338_v52 = vpop.f32.mrb[29].mxu1 }
 0xb62   :  { %v1420_v45 = vsel %vm592_vm4, %v1338_v52, -1e+30  ;;  %v2975_v46 = vpop.f32.mrb[30].mxu1  ;;  %v1432_v47 = vsel %vm748_vm5, %v1422_v33, -inf }
 0xb63   :  { %v1426_v48 = vsel %vm748_vm5, %v1420_v45, -inf  ;;  %1433 = vmax.xlane.f32.xlu0 %v1432_v47  ;;  %v1341_v28 = vpop.f32.mrb[31].mxu1 }
 0xb64   :  { %v1421_v51 = vsel %vm592_vm4, %v1341_v28, -1e+30  ;;  %v3957_v31 = vpop.f32.mrb[24].mxu0  ;;  %1427 = vmax.xlane.f32.xlu1 %v1426_v48 }
 0xb65   :  { %v3959_v55 = vpop.f32.mrb[25].mxu0  ;;  %v1429_v20 = vsel %vm748_vm5, %v1421_v51, -inf }
 0xb66   :  { %v3184_v42 = vpack.i.bf16 %v3959_v55, %v3941_v2  ;;  %v2967_v38 = vpop.f32.mrb[26].mxu0 }
 0xb67   :  { %v3964_v60 = vpop.f32.mrb[27].mxu0  ;;  %1430 = vmax.xlane.f32.xlu0 %v1429_v20 }
 0xb68   :  { %v3199_v62 = vpack.i.bf16 %v3957_v31, %v3964_v60 }
 0xb74   :  { %v2982_v5 = vpop.f32.mrb[28].mxu0 }
 0xb75   :  { %v1406_v11 = vpop.f32.mrb[29].mxu0  ;;  %v1425_v22 = vsel %vm592_vm4, %v2982_v5, -1e+30 }
 0xb76   :  { %v1423_v6 = vsel %vm592_vm4, %v1406_v11, -1e+30  ;;  %v2983_v19 = vpop.f32.mrb[30].mxu0  ;;  %v1441_v30 = vsel %vm748_vm5, %v1425_v22, -inf }
 0xb77   :  { %v1435_v9 = vsel %vm748_vm5, %v1423_v6, -inf  ;;  %v1409_v13 = vpop.f32.mrb[31].mxu0 }
 0xb78   :  { %v3975_v26 = vsel %vm592_vm4, %v1409_v13, -1e+30  ;;  %1436 = vmax.xlane.f32.xlu1 %v1435_v9 }
 0xb79   :  { %v1438_v29 = vsel %vm748_vm5, %v3975_v26, -inf }
 0xb7a   :  { %1439 = vmax.xlane.f32.xlu0 %v1438_v29 }
 0xb7c   :  { %1442 = vmax.xlane.f32.xlu1 %v1441_v30 }
 0xb8d   :  { %1498 = vrot.lane.b32.xlu1 %v3760_v39, %s3427_s0 }
 0xb90   :  { %1496 = vrot.lane.b32.xlu0 %v3753_v50, %s3427_s0 }
 0xb91   :  { %1558 = vrot.lane.b32.xlu1 %v3763_v7, %s3427_s0 }
 0xb95   :  { %1560 = vrot.lane.b32.xlu1 %v3767_v3, %s3427_s0 }
 0xbf0   :  { %v1434_v34 = vpop.xlane.xlu0 %1433 }
 0xbf1   :  { %v1446_v15 = vsub.f32 %v1422_v33, %v1434_v34  ;;  %v1428_v14 = vpop.xlane.xlu1 %1427 }
 0xbf2   :  { %v1444_v17 = vsub.f32 %v1420_v45, %v1428_v14 }
 0xbf3   :  { %v1454_v24 = vmul.f32 1.442695, %v1446_v15 }
 0xbf4   :  { %v1450_v52 = vmul.f32 1.442695, %v1444_v17  ;;  %v1431_v46 = vpop.xlane.xlu0 %1430 }
 0xbf5   :  { %3318 = vpow2.f32 %v1454_v24  ;;  %v1445_v47 = vsub.f32 %v1421_v51, %v1431_v46 }
 0xbf6   :  { %3320 = vpow2.f32 %v1450_v52 }
 0xbf7   :  { %v1452_v48 = vmul.f32 1.442695, %v1445_v47 }
 0xbf9   :  { %3322 = vpow2.f32 %v1452_v48 }
 0xbff   :  { %v3984_v28 = vpop.eup %3318 }
 0xc00   :  { %v1468_v20 = vsel %vm748_vm5, %v3984_v28, 0.0  ;;  %v3988_v38 = vpop.eup %3320 }
 0xc01   :  { %1469 = vadd.xlane.f32.xlu0 %v1468_v20  ;;  %v1462_v33 = vsel %vm748_vm5, %v3988_v38, 0.0 }
 0xc03   :  { %v3323_v5 = vpop.eup %3322 }
 0xc04   :  { %v1465_v45 = vsel %vm748_vm5, %v3323_v5, 0.0 }
 0xc05   :  { %v1437_v11 = vpop.xlane.xlu1 %1436  ;;  %1463 = vadd.xlane.f32.xlu0 %v1462_v33  ;;  %1466 = vadd.xlane.f32.xlu1 %v1465_v45 }
 0xc06   :  { %v1447_v19 = vsub.f32 %v1423_v6, %v1437_v11 }
 0xc07   :  { %v1440_v51 = vpop.xlane.xlu0 %1439 }
 0xc08   :  { %v1456_v30 = vmul.f32 1.442695, %v1447_v19  ;;  %v1448_v48 = vsub.f32 %v3975_v26, %v1440_v51 }
 0xc09   :  { %v1443_v9 = vpop.xlane.xlu1 %1442 }
 0xc0a   :  { %v1449_v13 = vsub.f32 %v1425_v22, %v1443_v9  ;;  %v1458_v20 = vmul.f32 1.442695, %v1448_v48 }
 0xc0b   :  { %v1497_v29 = vpop.permute.xlu0 %1496 }
 0xc0c   :  { %v1460_v34 = vmul.f32 1.442695, %v1449_v13  ;;  %2984 = vmatprep.subr.bf16.mxu1 %v1497_v29 }
 0xc0d   :  { %v1499_v15 = vpop.permute.xlu1 %1498  ;;  %2985 = vmatpush3.bf16.msra.mxu1 %v1497_v29 }
 0xc0e   :  { %3324 = vpow2.f32 %v1460_v34  ;;  %3140 = vmatprep.subr.msk.bf16.mxu1 %vm830_vm6, %v1499_v15  ;;  %v1508_v14 = vsel %vm830_vm6, %v1499_v15, 0 }
 0xc0f   :  { %3326 = vpow2.f32 %v1456_v30 }
 0xc10   :  { %3328 = vpow2.f32 %v1458_v20 }
 0xc11   :  { %v1559_v17 = vpop.permute.xlu1 %1558  ;;  %2987 = vmatpush3.bf16.msra.mxu1 %v1508_v14 }
 0xc12   :  { %2992 = vmatprep.subr.bf16.mxu0 %v1559_v17 }
 0xc13   :  { %2993 = vmatpush3.bf16.msra.mxu0 %v1559_v17 }
 0xc15   :  { %v1561_v24 = vpop.permute.xlu1 %1560 }
 0xc16   :  { %v1570_v6 = vsel %vm830_vm6, %v1561_v24, 0  ;;  %3141 = vmatprep.subr.msk.bf16.mxu0 %vm830_vm6, %v1561_v24 }
 0xc17   :  { %2995 = vmatpush3.bf16.msra.mxu0 %v1570_v6 }
 0xc18   :  { %v3325_v22 = vpop.eup %3324 }
 0xc19   :  { %v1477_v52 = vsel %vm748_vm5, %v3325_v22, 0.0  ;;  %v3327_v46 = vpop.eup %3326 }
 0xc1a   :  { %1478 = vadd.xlane.f32.xlu1 %v1477_v52  ;;  %v1471_v47 = vsel %vm748_vm5, %v3327_v46, 0.0  ;;  %v3329_v33 = vpop.eup %3328 }
 0xc1b   :  { %1624 = vrot.lane.b32.xlu0 %v3753_v50, %s3428_s1  ;;  %v1474_v45 = vsel %vm748_vm5, %v3329_v33, 0.0 }
 0xc1e   :  { %1472 = vadd.xlane.f32.xlu1 %v1471_v47 }
 0xc2f   :  { %1692 = vrot.lane.b32.xlu1 %v3763_v7, %s3428_s1 }
 0xc33   :  { %1622 = vrot.lane.b32.xlu1 %v3777_v21, %s3429_s29 }
 0xc37   :  { %1688 = vrot.lane.b32.xlu1 %v3765_v12, %s3429_s29 }
 0xc3a   :  { %1475 = vadd.xlane.f32.xlu0 %v1474_v45 }
 0xc50   :  { %1626 = vrot.lane.b32.xlu0 %v3760_v39, %s3428_s1 }
 0xc54   :  { %1620 = vrot.lane.b32.xlu0 %v3755_v53, %s3429_s29 }
 0xc58   :  { %1694 = vrot.lane.b32.xlu0 %v3767_v3, %s3428_s1 }
 0xc5c   :  { %1690 = vrot.lane.b32.xlu0 %v3785_v57, %s3429_s29 }
 0xc8e   :  { %v1470_v26 = vpop.xlane.xlu0 %1469 }
 0xc8f   :  { %3330 = vrcp.f32 %v1470_v26 }
 0xc92   :  { %v1467_v11 = vpop.xlane.xlu1 %1466  ;;  %v1464_v51 = vpop.xlane.xlu0 %1463 }
 0xc93   :  { %3332 = vrcp.f32 %v1467_v11 }
 0xc94   :  { %3334 = vrcp.f32 %v1464_v51 }
 0xc96   :  { %v1625_v21 = vpop.permute.xlu0 %1624 }
 0xc97   :  { %3142 = vmatprep.subr.msk.bf16.mxu1 %vm613_vm3, %v1625_v21  ;;  %v1635_v57 = vsel %vm613_vm3, %v1625_v21, 0 }
 0xc99   :  { %v3331_v12 = vpop.eup %3330 }
 0xc9a   :  { %v1488_v13 = vmul.f32 %v3331_v12, %v3984_v28 }
 0xc9c   :  { %v1493_v34 = vpack.c.bf16 %v1488_v13, %v1488_v13 }
 0xc9d   :  { %v3333_v19 = vpop.eup %3332 }
 0xc9e   :  { %v3335_v9 = vpop.eup %3334  ;;  %v1487_v29 = vmul.f32 %v3333_v19, %v3323_v5 }
 0xc9f   :  { %v1486_v53 = vmul.f32 %v3335_v9, %v3988_v38 }
 0xca1   :  { %v1492_v30 = vpack.c.bf16 %v1487_v29, %v1486_v53 }
 0xca3   :  { %2988 = vmatprep.mubr.msk.bf16.mxu1 %vm748_vm5, %v1492_v30 }
 0xca4   :  { %2989 = vmatmul.mubr.msk.bf16.vlgmr.msra.gmra.mrb[32].mxu1 %vm748_vm5, %v1493_v34 }
 0xca5   :  { %3001 = vmatpush3.bf16.xpose.msra.mxu1 %v1635_v57 }
 0xca7   :  { %v1479_v15 = vpop.xlane.xlu1 %1478 }
 0xca8   :  { %3336 = vrcp.f32 %v1479_v15 }
 0xcab   :  { %v1473_v14 = vpop.xlane.xlu1 %1472 }
 0xcac   :  { %3338 = vrcp.f32 %v1473_v14 }
 0xcaf   :  { %v1693_v17 = vpop.permute.xlu1 %1692 }
 0xcb0   :  { %3144 = vmatprep.subr.msk.bf16.mxu0 %vm613_vm3, %v1693_v17  ;;  %v1703_v21 = vsel %vm613_vm3, %v1693_v17, 0 }
 0xcb2   :  { %v3337_v24 = vpop.eup %3336 }
 0xcb3   :  { %v1491_v48 = vmul.f32 %v3337_v24, %v3325_v22  ;;  %v1623_v20 = vpop.permute.xlu1 %1622 }
 0xcb5   :  { %v1495_v51 = vpack.c.bf16 %v1491_v48, %v1491_v48 }
 0xcb6   :  { %v3339_v52 = vpop.eup %3338 }
 0xcb7   :  { %v1489_v45 = vmul.f32 %v3339_v52, %v3327_v46  ;;  %v1689_v12 = vpop.permute.xlu1 %1688 }
 0xcc7   :  { %v1476_v28 = vpop.xlane.xlu0 %1475 }
 0xcc8   :  { %3340 = vrcp.f32 %v1476_v28 }
 0xccb   :  { %v1627_v5 = vpop.permute.xlu0 %1626 }
 0xccc   :  { %v1638_v38 = vsel %vm613_vm3, %v1627_v5, 0  ;;  %3143 = vmatprep.subr.msk.bf16.mxu1 %vm613_vm3, %v1627_v5 }
 0xccd   :  { %3003 = vmatpush3.bf16.xpose.msra.mxu1 %v1638_v38 }
 0xccf   :  { %v1621_v6 = vpop.permute.xlu0 %1620 }
 0xcd0   :  { %3004 = vmatprep.mubr.msk.bf16.mxu1 %vm613_vm3, %v1621_v6 }
 0xcd2   :  { %v3341_v47 = vpop.eup %3340 }
 0xcd3   :  { %v1490_v26 = vmul.f32 %v3341_v47, %v3329_v33  ;;  %v1695_v19 = vpop.permute.xlu0 %1694 }
 0xcd4   :  { %3005 = vmatmul.mubr.msk.bf16.vlgmr.msra.gmra.mrb[36].mxu1 %vm613_vm3, %v1623_v20  ;;  %v1706_v22 = vsel %vm613_vm3, %v1695_v19, 0 }
 0xcd5   :  { %v1494_v11 = vpack.c.bf16 %v1490_v26, %v1489_v45 }
 0xcd7   :  { %2996 = vmatprep.mubr.msk.bf16.mxu0 %vm748_vm5, %v1494_v11  ;;  %v1691_v46 = vpop.permute.xlu0 %1690 }
 0xcd8   :  { %2997 = vmatmul.mubr.msk.bf16.vlgmr.msra.gmra.mrb[32].mxu0 %vm748_vm5, %v1495_v51 }
 0xcd9   :  { %3009 = vmatpush3.bf16.xpose.msra.mxu0 %v1703_v21  ;;  %3012 = vmatprep.mubr.msk.bf16.mxu0 %vm613_vm3, %v1689_v12 }
 0xcda   :  { %3145 = vmatprep.subr.msk.bf16.mxu0 %vm613_vm3, %v1695_v19 }
 0xce1   :  { %3011 = vmatpush3.bf16.xpose.msra.mxu0 %v1706_v22 }
 0xce8   :  { %3013 = vmatmul.mubr.msk.bf16.vlgmr.msra.gmra.mrb[36].mxu0 %vm613_vm3, %v1691_v46 }
 0xd77   :  { %v4027_v33 = vpop.f32.mrb[32].mxu1 }
 0xd78   :  { %v4029_v9 = vpop.f32.mrb[33].mxu1 }
 0xd79   :  { %v2991_v13 = vpop.f32.mrb[34].mxu1 }
 0xd7a   :  { %v4031_v29 = vpop.f32.mrb[35].mxu1 }
 0xd7b   :  { %v3174_v53 = vpack.i.bf16 %v4031_v29, %v4029_v9 }
 0xda7   :  { %v3006_v30 = vpop.f32.mrb[36].mxu1 }
 0xda8   :  { %v1674_v34 = vpop.f32.mrb[37].mxu1  ;;  %v1758_v6 = vsel %vm592_vm4, %v3006_v30, -1e+30 }
 0xda9   :  { %v1756_v57 = vsel %vm592_vm4, %v1674_v34, -1e+30  ;;  %v3007_v15 = vpop.f32.mrb[38].mxu1  ;;  %v1768_v45 = vsel %vm748_vm5, %v1758_v6, -inf }
 0xdaa   :  { %v1762_v14 = vsel %vm748_vm5, %v1756_v57, -inf  ;;  %v1677_v17 = vpop.f32.mrb[39].mxu1 }
 0xdab   :  { %v1757_v28 = vsel %vm592_vm4, %v1677_v17, -1e+30  ;;  %v4040_v5 = vpop.f32.mrb[32].mxu0  ;;  %1763 = vmax.xlane.f32.xlu1 %v1762_v14 }
 0xdac   :  { %v1765_v38 = vsel %vm748_vm5, %v1757_v28, -inf  ;;  %v4043_v24 = vpop.f32.mrb[33].mxu0 }
 0xdad   :  { %v3189_v52 = vpack.i.bf16 %v4043_v24, %v4027_v33  ;;  %v2999_v47 = vpop.f32.mrb[34].mxu0  ;;  %1766 = vmax.xlane.f32.xlu0 %v1765_v38 }
 0xdae   :  { %v4049_v48 = vpop.f32.mrb[35].mxu0 }
 0xdaf   :  { %v3204_v20 = vpack.i.bf16 %v4040_v5, %v4049_v48 }
 0xdb1   :  { %1769 = vmax.xlane.f32.xlu0 %v1768_v45 }
 0xdbb   :  { %v3014_v26 = vpop.f32.mrb[36].mxu0 }
 0xdbc   :  { %v1742_v11 = vpop.f32.mrb[37].mxu0  ;;  %v1761_v22 = vsel %vm592_vm4, %v3014_v26, -1e+30 }
 0xdbd   :  { %v1759_v51 = vsel %vm592_vm4, %v1742_v11, -1e+30  ;;  %v3015_v21 = vpop.f32.mrb[38].mxu0  ;;  %v1777_v30 = vsel %vm748_vm5, %v1761_v22, -inf }
 0xdbe   :  { %v1771_v12 = vsel %vm748_vm5, %v1759_v51, -inf  ;;  %v1745_v19 = vpop.f32.mrb[39].mxu0 }
 0xdbf   :  { %v1760_v46 = vsel %vm592_vm4, %v1745_v19, -1e+30  ;;  %1772 = vmax.xlane.f32.xlu1 %v1771_v12 }
 0xdc0   :  { %v1774_v13 = vsel %vm748_vm5, %v1760_v46, -inf }
 0xdc1   :  { %1775 = vmax.xlane.f32.xlu0 %v1774_v13 }
 0xdc3   :  { %1778 = vmax.xlane.f32.xlu1 %v1777_v30 }
 0xdd4   :  { %1834 = vrot.lane.b32.xlu1 %v3760_v39, %s3430_s30 }
 0xe38   :  { %v1764_v34 = vpop.xlane.xlu1 %1763 }
 0xe39   :  { %v1780_v17 = vsub.f32 %v1756_v57, %v1764_v34 }
 0xe3a   :  { %v1767_v15 = vpop.xlane.xlu0 %1766 }
 0xe3b   :  { %v1781_v14 = vsub.f32 %v1757_v28, %v1767_v15  ;;  %v1786_v45 = vmul.f32 1.442695, %v1780_v17 }
 0xe3d   :  { %v1788_v38 = vmul.f32 1.442695, %v1781_v14 }
 0xe3e   :  { %v1770_v47 = vpop.xlane.xlu0 %1769 }
 0xe3f   :  { %3342 = vpow2.f32 %v1788_v38  ;;  %v1782_v16 = vsub.f32 %v1758_v6, %v1770_v47 }
 0xe41   :  { %v1790_v26 = vmul.f32 1.442695, %v1782_v16 }
 0xe43   :  { %3344 = vpow2.f32 %v1790_v26 }
 0xe44   :  { %3346 = vpow2.f32 %v1786_v45 }
 0xe49   :  { %v3343_v11 = vpop.eup %3342 }
 0xe4a   :  { %v1801_v21 = vsel %vm748_vm5, %v3343_v11, 0.0 }
 0xe4b   :  { %1802 = vadd.xlane.f32.xlu1 %v1801_v21 }
 0xe4c   :  { %v1773_v12 = vpop.xlane.xlu1 %1772 }
 0xe4d   :  { %v3345_v19 = vpop.eup %3344  ;;  %v1783_v30 = vsub.f32 %v1759_v51, %v1773_v12 }
 0xe4e   :  { %v1804_v39 = vsel %vm748_vm5, %v3345_v19, 0.0  ;;  %v3347_v13 = vpop.eup %3346  ;;  %v1776_v51 = vpop.xlane.xlu0 %1775 }
 0xe4f   :  { %1805 = vadd.xlane.f32.xlu0 %v1804_v39  ;;  %v1798_v34 = vsel %vm748_vm5, %v3347_v13, 0.0  ;;  %v1792_v6 = vmul.f32 1.442695, %v1783_v30 }
 0xe50   :  { %v1779_v57 = vpop.xlane.xlu1 %1778 }
 0xe51   :  { %v1785_v28 = vsub.f32 %v1761_v22, %v1779_v57  ;;  %v1784_v22 = vsub.f32 %v1760_v46, %v1776_v51 }
 0xe53   :  { %v1796_v15 = vmul.f32 1.442695, %v1785_v28  ;;  %1799 = vadd.xlane.f32.xlu0 %v1798_v34  ;;  %v1794_v16 = vmul.f32 1.442695, %v1784_v22  ;;  %v3220_v22 = vld [vmem:[%s4322_s7] sm:$0xff]  }
 0xe55   :  { %3348 = vpow2.f32 %v1796_v15 }
 0xe56   :  { %3350 = vpow2.f32 %v1792_v6 }
 0xe57   :  { %3352 = vpow2.f32 %v1794_v16 }
 0xe5f   :  { %v4068_v14 = vpop.eup %3348 }
 0xe60   :  { %v1813_v17 = vsel %vm748_vm5, %v4068_v14, 0.0  ;;  %v3351_v38 = vpop.eup %3350 }
 0xe61   :  { %1814 = vadd.xlane.f32.xlu1 %v1813_v17  ;;  %v1807_v47 = vsel %vm748_vm5, %v3351_v38, 0.0  ;;  %v3353_v45 = vpop.eup %3352 }
 0xe62   :  { %v1810_v26 = vsel %vm748_vm5, %v3353_v45, 0.0 }
 0xe65   :  { %1808 = vadd.xlane.f32.xlu1 %v1807_v47 }
 0xe69   :  { %1832 = vrot.lane.b32.xlu0 %v3753_v50, %s3430_s30  ;;  %v1835_v50 = vpop.permute.xlu1 %1834 }
 0xe6a   :  { %v1844_v29 = vsel %vm830_vm6, %v1835_v50, 0 }
 0xe76   :  { %1894 = vrot.lane.b32.xlu1 %v3763_v7, %s3430_s30 }
 0xe7a   :  { %3170 = vrot.lane.b32.xlu1 %v3169_v32, %s3431_s12 }
 0xe88   :  { %1811 = vadd.xlane.f32.xlu0 %v1810_v26 }
 0xe9e   :  { %1896 = vrot.lane.b32.xlu0 %v3767_v3, %s3430_s30 }
 0xea2   :  { %3175 = vrot.lane.b32.xlu0 %v3174_v53, %s3432_s13 }
 0xea6   :  { %3185 = vrot.lane.b32.xlu0 %v3184_v42, %s3431_s12 }
 0xed8   :  { %v1803_v7 = vpop.xlane.xlu1 %1802 }
 0xedc   :  { %v1806_v18 = vpop.xlane.xlu0 %1805 }
 0xedd   :  { %3354 = vrcp.f32 %v1806_v18 }
 0xede   :  { %3356 = vrcp.f32 %v1803_v7 }
 0xee0   :  { %v1800_v25 = vpop.xlane.xlu0 %1799 }
 0xee1   :  { %3358 = vrcp.f32 %v1800_v25 }
 0xee4   :  { %v1833_v32 = vpop.permute.xlu0 %1832 }
 0xee5   :  { %3016 = vmatprep.subr.bf16.mxu1 %v1833_v32 }
 0xee6   :  { %3017 = vmatpush3.bf16.msra.mxu1 %v1833_v32 }
 0xee7   :  { %3146 = vmatprep.subr.msk.bf16.mxu1 %vm830_vm6, %v1835_v50  ;;  %v3355_v3 = vpop.eup %3354 }
 0xee8   :  { %v3357_v9 = vpop.eup %3356  ;;  %v1824_v2 = vmul.f32 %v3355_v3, %v3345_v19 }
 0xee9   :  { %v1823_v42 = vmul.f32 %v3357_v9, %v3343_v11 }
 0xeea   :  { %3019 = vmatpush3.bf16.msra.mxu1 %v1844_v29  ;;  %v1829_v12 = vpack.c.bf16 %v1824_v2, %v1824_v2 }
 0xeeb   :  { %v3359_v53 = vpop.eup %3358  ;;  %3032 = vmatprep.subr.bf16.mxu1 %v3417_v43 }
 0xeec   :  { %v1822_v55 = vmul.f32 %v3359_v53, %v3347_v13 }
 0xeee   :  { %v1815_v46 = vpop.xlane.xlu1 %1814  ;;  %v1828_v21 = vpack.c.bf16 %v1823_v42, %v1822_v55 }
 0xeef   :  { %3360 = vrcp.f32 %v1815_v46 }
 0xef0   :  { %3020 = vmatprep.mubr.msk.bf16.mxu1 %vm748_vm5, %v1828_v21 }
 0xef1   :  { %3021 = vmatmul.mubr.msk.bf16.vlgmr.msra.gmra.mrb[40].mxu1 %vm748_vm5, %v1829_v12 }
 0xef2   :  { %v1809_v39 = vpop.xlane.xlu1 %1808  ;;  %3036 = vmatprep.mubr.msk.bf16.mxu1 %vm3418_vm1, %v3417_v43  ;;  %3033 = vmatpush3.bf16.msra.mxu1 %v3220_v22 }
 0xef3   :  { %3362 = vrcp.f32 %v1809_v39  ;;  %3034 = vmatprep.subr.bf16.mxu1 %v3417_v43 }
 0xef6   :  { %v1895_v30 = vpop.permute.xlu1 %1894 }
 0xef7   :  { %3024 = vmatprep.subr.bf16.mxu0 %v1895_v30 }
 0xef8   :  { %3025 = vmatpush3.bf16.msra.mxu0 %v1895_v30 }
 0xef9   :  { %v3361_v57 = vpop.eup %3360 }
 0xefa   :  { %v1827_v6 = vmul.f32 %v3361_v57, %v4068_v14  ;;  %v3221_v14 = vld [vmem:[%s4322_s7 + $0x8] sm:$0xff]   ;;  %v3171_v33 = vpop.permute.xlu1 %3170 }
 0xefb   :  { %3035 = vmatpush3.bf16.msra.mxu1 %v3221_v14  ;;  %v3172_v29 = vunpack.i.l.bf16 %v3171_v33 }
 0xefc   :  { %v1831_v51 = vpack.c.bf16 %v1827_v6, %v1827_v6  ;;  %3064 = vmatprep.subr.bf16.mxu1 %v3417_v43 }
 0xefd   :  { %v3363_v28 = vpop.eup %3362  ;;  %v2028_v2 = vsel %vm613_vm3, %v3863_v41, %v3172_v29 }
 0xefe   :  { %v1825_v15 = vmul.f32 %v3363_v28, %v3351_v38 }
 0xf15   :  { %v1812_v19 = vpop.xlane.xlu0 %1811 }
 0xf16   :  { %3364 = vrcp.f32 %v1812_v19 }
 0xf19   :  { %v1897_v13 = vpop.permute.xlu0 %1896 }
 0xf1a   :  { %v1906_v11 = vsel %vm830_vm6, %v1897_v13, 0  ;;  %3147 = vmatprep.subr.msk.bf16.mxu0 %vm830_vm6, %v1897_v13 }
 0xf1b   :  { %3027 = vmatpush3.bf16.msra.mxu0 %v1906_v11 }
 0xf1c   :  { %3048 = vmatprep.subr.bf16.mxu0 %v3417_v43 }
 0xf1d   :  { %v3176_v24 = vpop.permute.xlu0 %3175 }
 0xf1e   :  { %v3178_v53 = vunpack.i.h.bf16 %v3176_v24  ;;  %v3177_v31 = vunpack.i.l.bf16 %v3176_v24 }
 0xf20   :  { %v3365_v34 = vpop.eup %3364  ;;  %v2035_v5 = vsel %vm2034_vm7, %v2028_v2, %v3177_v31 }
 0xf21   :  { %v1826_v17 = vmul.f32 %v3365_v34, %v3353_v45  ;;  %v3186_v12 = vpop.permute.xlu0 %3185 }
 0xf22   :  { %v3188_v39 = vunpack.i.h.bf16 %v3186_v12  ;;  %v3187_v41 = vunpack.i.l.bf16 %v3186_v12 }
 0xf23   :  { %v1830_v47 = vpack.c.bf16 %v1826_v17, %v1825_v15 }
 0xf24   :  { %v2031_v57 = vsel %vm613_vm3, %v3878_v1, %v3188_v39  ;;  %v2030_v28 = vsel %vm613_vm3, %v3861_v36, %v3187_v41 }
 0xf25   :  { %3028 = vmatprep.mubr.msk.bf16.mxu0 %vm748_vm5, %v1830_v47 }
 0xf26   :  { %3029 = vmatmul.mubr.msk.bf16.vlgmr.msra.gmra.mrb[40].mxu0 %vm748_vm5, %v1831_v51 }
 0xf27   :  { %3052 = vmatprep.mubr.msk.bf16.mxu0 %vm3418_vm1, %v3417_v43 }
 0xfc4   :  { %v3022_v38 = vpop.f32.mrb[40].mxu1 }
 0xfc5   :  { %v1880_v16 = vpop.f32.mrb[41].mxu1 }
 0xfc6   :  { %v3023_v45 = vpop.f32.mrb[42].mxu1 }
 0xfc7   :  { %v1883_v26 = vpop.f32.mrb[43].mxu1 }
 0xfc8   :  { %v3179_v50 = vpack.i.bf16 %v1883_v26, %v1880_v16 }
 0xfca   :  { %3180 = vrot.lane.b32.xlu1 %v3179_v50, %s3433_s17 }
 0xfce   :  { %3190 = vrot.lane.b32.xlu1 %v3189_v52, %s3432_s13  ;;  %v3173_v52 = vunpack.i.h.bf16 %v3171_v33 }
 0xfd2   :  { %3200 = vrot.lane.b32.xlu1 %v3199_v62, %s3431_s12  ;;  %v2029_v62 = vsel %vm613_vm3, %v3865_v44, %v3173_v52 }
 0xfd3   :  { %v2036_v46 = vsel %vm2034_vm7, %v2029_v62, %v3178_v53 }
 0xff9   :  { %v3030_v7 = vpop.f32.mrb[40].mxu0 }
 0xffa   :  { %v1942_v18 = vpop.f32.mrb[41].mxu0 }
 0xffb   :  { %v3194_v25 = vpack.i.bf16 %v1942_v18, %v3022_v38  ;;  %v3031_v32 = vpop.f32.mrb[42].mxu0 }
 0xffc   :  { %v1945_v3 = vpop.f32.mrb[43].mxu0 }
 0xffd   :  { %v3209_v9 = vpack.i.bf16 %v3030_v7, %v1945_v3  ;;  %3195 = vrot.lane.b32.xlu0 %v3194_v25, %s3433_s17 }
 0xfff   :  { %3210 = vrot.lane.b32.xlu1 %v3209_v9, %s3433_s17 }
0x1001   :  { %3205 = vrot.lane.b32.xlu0 %v3204_v20, %s3432_s13 }
0x103c   :  { %v3181_v60 = vpop.permute.xlu1 %3180 }
0x103d   :  { %v3183_v55 = vunpack.i.h.bf16 %v3181_v60  ;;  %v3182_v42 = vunpack.i.l.bf16 %v3181_v60 }
0x103f   :  { %v2041_v48 = vsel %vm748_vm5, %v2035_v5, %v3182_v42  ;;  %v2042_v20 = vsel %vm748_vm5, %v2036_v46, %v3183_v55 }
0x1040   :  { %v2047_v21 = vpack.c.bf16 %v2042_v20, %v2041_v48  ;;  %v3191_v44 = vpop.permute.xlu1 %3190 }
0x1041   :  { %v3193_v30 = vunpack.i.h.bf16 %v3191_v44  ;;  %v3192_v19 = vunpack.i.l.bf16 %v3191_v44 }
0x1042   :  { %3037 = vmatmul.mubr.msk.bf16.vlgmr.msra.gmra.mrb[44].mxu1 %vm253_vm2, %v2047_v21 }
0x1043   :  { %3040 = vmatprep.mubr.msk.bf16.mxu1 %vm3418_vm1, %v3417_v43  ;;  %v2037_v15 = vsel %vm2034_vm7, %v2030_v28, %v3192_v19  ;;  %v2038_v17 = vsel %vm2034_vm7, %v2031_v57, %v3193_v30 }
0x1044   :  { %v3201_v13 = vpop.permute.xlu1 %3200 }
0x1045   :  { %v3203_v47 = vunpack.i.h.bf16 %v3201_v13  ;;  %v3202_v51 = vunpack.i.l.bf16 %v3201_v13 }
0x1047   :  { %v2033_v36 = vsel %vm613_vm3, %v3876_v63, %v3203_v47  ;;  %v2032_v50 = vsel %vm613_vm3, %v3880_v10, %v3202_v51  ;;  %v2056_v63 = vsub.s32 7, %v3572_v59  ;;  %v3392_v10 = vld [vmem:[%s4318_s3] sm:$0xff] }
0x1049   :  { %v2057_v24 = vrot.slane %v3392_v10, %v2056_v63 }
0x106f   :  { %v3196_v11 = vpop.permute.xlu0 %3195 }
0x1070   :  { %v3198_v34 = vunpack.i.h.bf16 %v3196_v11  ;;  %v3197_v6 = vunpack.i.l.bf16 %v3196_v11 }
0x1071   :  { %v3211_v38 = vpop.permute.xlu1 %3210 }
0x1072   :  { %v2043_v22 = vsel %vm748_vm5, %v2037_v15, %v3197_v6  ;;  %v2044_v14 = vsel %vm748_vm5, %v2038_v17, %v3198_v34  ;;  %v3213_v7 = vunpack.i.h.bf16 %v3211_v38  ;;  %v3212_v18 = vunpack.i.l.bf16 %v3211_v38 }
0x1073   :  { %v2048_v16 = vpack.c.bf16 %v2044_v14, %v2043_v22  ;;  %v3206_v45 = vpop.permute.xlu0 %3205 }
0x1074   :  { %v3208_v26 = vunpack.i.h.bf16 %v3206_v45  ;;  %v3207_v1 = vunpack.i.l.bf16 %v3206_v45  ;;  %v3222_v45 = vld [vmem:[%s4323_s8] sm:$0xff]  }
0x1075   :  { %3041 = vmatmul.mubr.msk.bf16.gmra.mrb[48].mxu1 %vm253_vm2, %v2048_v16  ;;  %3049 = vmatpush3.bf16.msra.mxu0 %v3222_v45 }
0x1076   :  { %v2040_v25 = vsel %vm2034_vm7, %v2033_v36, %v3208_v26  ;;  %v2039_v32 = vsel %vm2034_vm7, %v2032_v50, %v3207_v1  ;;  %3044 = vmatprep.mubr.msk.bf16.mxu1 %vm3418_vm1, %v3417_v43  ;;  %v3223_v26 = vld [vmem:[%s4323_s8 + $0x8] sm:$0xff]   ;;  %3050 = vmatprep.subr.bf16.mxu0 %v3417_v43 }
0x1077   :  { %v2045_v3 = vsel %vm748_vm5, %v2039_v32, %v3212_v18  ;;  %v2046_v9 = vsel %vm748_vm5, %v2040_v25, %v3213_v7 }
0x1078   :  { %v2049_v33 = vpack.c.bf16 %v2046_v9, %v2045_v3 }
0x1079   :  { %3051 = vmatpush3.bf16.msra.mxu0 %v3223_v26 }
0x107d   :  { %3045 = vmatmul.mubr.msk.bf16.gmra.mrb[52].mxu1 %vm253_vm2, %v2049_v33 }
0x107e   :  { %3080 = vmatprep.mubr.msk.bf16.mxu1 %vm3418_vm1, %v3417_v43 }
0x1115   :  { %v2113_v52 = vpop.f32.mrb[44].mxu1 }
0x1116   :  { %v2114_v29 = vadd.f32 %v2113_v52, %v2057_v24  ;;  %v3038_v53 = vpop.f32.mrb[45].mxu1 }
0x1117   :  { %v2116_v31 = vpop.f32.mrb[46].mxu1 }
0x1118   :  { %v4165_v60 = vadd.f32 %v2114_v29, %v3678_v27  ;;  %v2117_v62 = vadd.f32 %v2116_v31, %v2057_v24  ;;  %v3039_v2 = vpop.f32.mrb[47].mxu1 }
0x111a   :  { %v4168_v55 = vadd.f32 %v2117_v62, %v3675_v23  ;;  %v2142_v42 = vsel %vm253_vm2, %v4165_v60, 0.0 }
0x111b   :  { %2143 = vadd.xlane.f32.xlu0 %v2142_v42 }
0x111c   :  { %v2145_v46 = vsel %vm253_vm2, %v4168_v55, 0.0 }
0x111d   :  { %2146 = vadd.xlane.f32.xlu1 %v2145_v46 }
0x1148   :  { %v2121_v5 = vpop.f32.mrb[48].mxu1 }
0x1149   :  { %v2122_v48 = vadd.f32 %v2121_v5, %v2057_v24  ;;  %v3042_v20 = vpop.f32.mrb[49].mxu1 }
0x114a   :  { %v2124_v21 = vpop.f32.mrb[50].mxu1 }
0x114b   :  { %v4175_v27 = vadd.f32 %v2122_v48, %v3690_v35  ;;  %v2125_v44 = vadd.f32 %v2124_v21, %v2057_v24  ;;  %v3043_v12 = vpop.f32.mrb[51].mxu1 }
0x114c   :  { %v4216_v12 = vld [vmem:[%s4318_s3 + $0x8] sm:$0xff] }
0x114d   :  { %v4178_v23 = vadd.f32 %v2125_v44, %v3693_v40  ;;  %v2148_v39 = vsel %vm253_vm2, %v4175_v27, 0.0 }
0x114e   :  { %2149 = vadd.xlane.f32.xlu0 %v2148_v39  ;;  %v2223_v39 = vrot.slane %v4216_v12, %v130_v0 }
0x114f   :  { %v2151_v13 = vsel %vm253_vm2, %v4178_v23, 0.0 }
0x1150   :  { %v2129_v41 = vpop.f32.mrb[52].mxu1 }
0x1151   :  { %v2130_v30 = vadd.f32 %v2129_v41, %v2057_v24  ;;  %v3046_v19 = vpop.f32.mrb[53].mxu1 }
0x1152   :  { %2152 = vadd.xlane.f32.xlu0 %v2151_v13  ;;  %v2132_v11 = vpop.f32.mrb[54].mxu1  ;;  %v2233_v13 = vrot.slane %v4216_v12, %v140_v8 }
0x1153   :  { %v4185_v35 = vadd.f32 %v2130_v30, %v3702_v49  ;;  %v2133_v57 = vadd.f32 %v2132_v11, %v2057_v24  ;;  %v3047_v28 = vpop.f32.mrb[55].mxu1 }
0x1155   :  { %v4188_v40 = vadd.f32 %v2133_v57, %v3710_v4  ;;  %v2154_v34 = vsel %vm253_vm2, %v4185_v35, 0.0 }
0x1156   :  { %2155 = vadd.xlane.f32.xlu1 %v2154_v34 }
0x1157   :  { %v2157_v6 = vsel %vm253_vm2, %v4188_v40, 0.0 }
0x1158   :  { %2158 = vadd.xlane.f32.xlu0 %v2157_v6 }
0x11a8   :  { %v2144_v15 = vpop.xlane.xlu0 %2143 }
0x11a9   :  { %v2160_v17 = vmul.f32 0.03125, %v2144_v15 }
0x11aa   :  { %v2147_v47 = vpop.xlane.xlu1 %2146 }
0x11ab   :  { %v2166_v51 = vsub.f32 %v4165_v60, %v2160_v17  ;;  %v2161_v49 = vmul.f32 0.03125, %v2147_v47 }
0x11ad   :  { %v2167_v22 = vsub.f32 %v4168_v55, %v2161_v49  ;;  %v2172_v14 = vmul.f32 %v2166_v51, %v2166_v51 }
0x11af   :  { %v2178_v4 = vsel %vm253_vm2, %v2172_v14, 0.0  ;;  %v2173_v38 = vmul.f32 %v2167_v22, %v2167_v22 }
0x11b0   :  { %2179 = vadd.xlane.f32.xlu1 %v2178_v4 }
0x11b1   :  { %v2181_v16 = vsel %vm253_vm2, %v2173_v38, 0.0 }
0x11b2   :  { %2182 = vadd.xlane.f32.xlu0 %v2181_v16 }
0x11db   :  { %v2150_v1 = vpop.xlane.xlu0 %2149 }
0x11dc   :  { %v2162_v36 = vmul.f32 0.03125, %v2150_v1 }
0x11de   :  { %v2168_v50 = vsub.f32 %v4175_v27, %v2162_v36 }
0x11df   :  { %v2153_v7 = vpop.xlane.xlu0 %2152 }
0x11e0   :  { %v2163_v18 = vmul.f32 0.03125, %v2153_v7  ;;  %v2174_v25 = vmul.f32 %v2168_v50, %v2168_v50 }
0x11e2   :  { %v2169_v32 = vsub.f32 %v4178_v23, %v2163_v18  ;;  %v2184_v3 = vsel %vm253_vm2, %v2174_v25, 0.0 }
0x11e3   :  { %2185 = vadd.xlane.f32.xlu1 %v2184_v3  ;;  %v2156_v9 = vpop.xlane.xlu1 %2155 }
0x11e4   :  { %v2164_v33 = vmul.f32 0.03125, %v2156_v9  ;;  %v2175_v63 = vmul.f32 %v2169_v32, %v2169_v32 }
0x11e5   :  { %v2159_v10 = vpop.xlane.xlu0 %2158 }
0x11e6   :  { %v2170_v24 = vsub.f32 %v4185_v35, %v2164_v33  ;;  %v2165_v52 = vmul.f32 0.03125, %v2159_v10  ;;  %v2187_v29 = vsel %vm253_vm2, %v2175_v63, 0.0 }
0x11e7   :  { %2188 = vadd.xlane.f32.xlu0 %v2187_v29 }
0x11e8   :  { %v2171_v53 = vsub.f32 %v4188_v40, %v2165_v52  ;;  %v2176_v31 = vmul.f32 %v2170_v24, %v2170_v24 }
0x11ea   :  { %v2190_v62 = vsel %vm253_vm2, %v2176_v31, 0.0  ;;  %v2177_v2 = vmul.f32 %v2171_v53, %v2171_v53 }
0x11eb   :  { %2191 = vadd.xlane.f32.xlu1 %v2190_v62 }
0x11ec   :  { %v2193_v42 = vsel %vm253_vm2, %v2177_v2, 0.0 }
0x11ed   :  { %2194 = vadd.xlane.f32.xlu0 %v2193_v42 }
0x123d   :  { %v2180_v46 = vpop.xlane.xlu1 %2179 }
0x123e   :  { %v2196_v5 = vmul.f32 0.03125, %v2180_v46  ;;  %v3227_v46 = vld [vmem:[%s4324_s9 + $0x18] sm:$0xff]  }
0x123f   :  { %v2183_v48 = vpop.xlane.xlu0 %2182 }
0x1240   :  { %v2202_v20 = vadd.f32 1e-05, %v2196_v5  ;;  %v2197_v21 = vmul.f32 0.03125, %v2183_v48  ;;  %v3228_v5 = vld [vmem:[%s4324_s9 + $0x20] sm:$0xff]   ;;  %v3229_v48 = vld [vmem:[%s4324_s9 + $0x28] sm:$0xff]  }
0x1242   :  { %3366 = vrsqrt.f32 %v2202_v20  ;;  %v2203_v44 = vadd.f32 1e-05, %v2197_v21  ;;  %v3230_v20 = vld [vmem:[%s4324_s9 + $0x30] sm:$0xff]   ;;  %v3231_v21 = vld [vmem:[%s4324_s9 + $0x38] sm:$0xff]  }
0x1244   :  { %3368 = vrsqrt.f32 %v2203_v44  ;;  %v2250_v44 = vrot.slane %v4216_v12, %v161_v37 }
0x124c   :  { %v3367_v41 = vpop.eup %3366 }
0x124d   :  { %v2214_v30 = vmul.f32 %v3367_v41, %v2166_v51 }
0x124e   :  { %v3369_v19 = vpop.eup %3368 }
0x124f   :  { %v2224_v11 = vmul.f32 %v2223_v39, %v2214_v30  ;;  %v2215_v57 = vmul.f32 %v3369_v19, %v2167_v22 }
0x1251   :  { %v2225_v28 = vmul.f32 %v2223_v39, %v2215_v57  ;;  %v2234_v34 = vadd.f32 %v2233_v13, %v2224_v11 }
0x1253   :  { %v2235_v6 = vadd.f32 %v2233_v13, %v2225_v28 }
0x1255   :  { %v2240_v15 = vpack.c.bf16 %v2235_v6, %v2234_v34 }
0x1257   :  { %3053 = vmatmul.mubr.msk.bf16.vlgmr.msra.gmra.mrb[44].mxu0 %vm253_vm2, %v2240_v15 }
0x1258   :  { %3056 = vmatprep.mubr.msk.bf16.mxu0 %vm3418_vm1, %v3417_v43 }
0x1270   :  { %v2186_v17 = vpop.xlane.xlu1 %2185 }
0x1271   :  { %v2198_v0 = vmul.f32 0.03125, %v2186_v17 }
0x1273   :  { %v2204_v47 = vadd.f32 1e-05, %v2198_v0 }
0x1274   :  { %v2189_v51 = vpop.xlane.xlu0 %2188 }
0x1275   :  { %3370 = vrsqrt.f32 %v2204_v47  ;;  %v2199_v49 = vmul.f32 0.03125, %v2189_v51 }
0x1277   :  { %v2205_v14 = vadd.f32 1e-05, %v2199_v49 }
0x1278   :  { %v2192_v4 = vpop.xlane.xlu1 %2191 }
0x1279   :  { %3372 = vrsqrt.f32 %v2205_v14  ;;  %v2200_v8 = vmul.f32 0.03125, %v2192_v4 }
0x127a   :  { %v2195_v22 = vpop.xlane.xlu0 %2194 }
0x127b   :  { %v2206_v38 = vadd.f32 1e-05, %v2200_v8  ;;  %v2201_v16 = vmul.f32 0.03125, %v2195_v22 }
0x127d   :  { %3374 = vrsqrt.f32 %v2206_v38  ;;  %v2207_v45 = vadd.f32 1e-05, %v2201_v16 }
0x127f   :  { %v3371_v26 = vpop.eup %3370  ;;  %3376 = vrsqrt.f32 %v2207_v45 }
0x1280   :  { %v2216_v1 = vmul.f32 %v3371_v26, %v2168_v50 }
0x1282   :  { %v2226_v18 = vmul.f32 %v2223_v39, %v2216_v1 }
0x1283   :  { %v3373_v36 = vpop.eup %3372 }
0x1284   :  { %v2217_v7 = vmul.f32 %v3373_v36, %v2169_v32  ;;  %v2236_v33 = vadd.f32 %v2233_v13, %v2226_v18  ;;  %v3224_v32 = vld [vmem:[%s4324_s9] sm:$0xff]  }
0x1285   :  { %3065 = vmatpush3.bf16.msra.mxu1 %v3224_v32 }
0x1286   :  { %v2227_v25 = vmul.f32 %v2223_v39, %v2217_v7  ;;  %3066 = vmatprep.subr.bf16.mxu1 %v3417_v43 }
0x1287   :  { %v3375_v3 = vpop.eup %3374 }
0x1288   :  { %v2218_v9 = vmul.f32 %v3375_v3, %v2170_v24  ;;  %v2237_v63 = vadd.f32 %v2233_v13, %v2227_v25  ;;  %v3225_v24 = vld [vmem:[%s4324_s9 + $0x8] sm:$0xff]  }
0x1289   :  { %v3377_v10 = vpop.eup %3376  ;;  %3067 = vmatpush3.bf16.msra.mxu1 %v3225_v24 }
0x128a   :  { %v2219_v52 = vmul.f32 %v3377_v10, %v2171_v53  ;;  %v2241_v29 = vpack.c.bf16 %v2237_v63, %v2236_v33  ;;  %v2228_v31 = vmul.f32 %v2223_v39, %v2218_v9  ;;  %3068 = vmatprep.subr.bf16.mxu1 %v3417_v43  ;;  %v3226_v53 = vld [vmem:[%s4324_s9 + $0x10] sm:$0xff]  }
0x128c   :  { %3057 = vmatmul.mubr.msk.bf16.gmra.mrb[48].mxu0 %vm253_vm2, %v2241_v29  ;;  %v2229_v62 = vmul.f32 %v2223_v39, %v2219_v52  ;;  %v2238_v50 = vadd.f32 %v2233_v13, %v2228_v31 }
0x128d   :  { %3060 = vmatprep.mubr.msk.bf16.mxu0 %vm3418_vm1, %v3417_v43  ;;  %3069 = vmatpush3.bf16.msra.mxu1 %v3226_v53 }
0x128e   :  { %v2239_v2 = vadd.f32 %v2233_v13, %v2229_v62  ;;  %3070 = vmatprep.subr.bf16.mxu1 %v3417_v43 }
0x1290   :  { %v2242_v42 = vpack.c.bf16 %v2239_v2, %v2238_v50 }
0x1291   :  { %3071 = vmatpush3.bf16.msra.mxu1 %v3227_v46 }
0x1292   :  { %3072 = vmatprep.subr.bf16.mxu1 %v3417_v43 }
0x1294   :  { %3061 = vmatmul.mubr.msk.bf16.gmra.mrb[52].mxu0 %vm253_vm2, %v2242_v42 }
0x1295   :  { %3104 = vmatprep.mubr.msk.f32.mxu0 %vm3418_vm1, %v3417_v43  ;;  %3073 = vmatpush3.bf16.msra.mxu1 %v3228_v5 }
0x1296   :  { %3074 = vmatprep.subr.bf16.mxu1 %v3417_v43 }
0x1299   :  { %3075 = vmatpush3.bf16.msra.mxu1 %v3229_v48 }
0x129a   :  { %3076 = vmatprep.subr.bf16.mxu1 %v3417_v43 }
0x129d   :  { %3077 = vmatpush3.bf16.msra.mxu1 %v3230_v20 }
0x129e   :  { %3078 = vmatprep.subr.bf16.mxu1 %v3417_v43 }
0x12a1   :  { %3079 = vmatpush3.bf16.msra.mxu1 %v3231_v21 }
0x132a   :  { %v2306_v39 = vpop.f32.mrb[44].mxu0 }
0x132b   :  { %v2307_v41 = vadd.f32 %v2306_v39, %v2250_v44  ;;  %v3054_v30 = vpop.f32.mrb[45].mxu0 }
0x132c   :  { %v2309_v19 = vpop.f32.mrb[46].mxu0 }
0x132d   :  { %v2329_v13 = vmul.f32 %v2307_v41, %v2307_v41  ;;  %v2310_v11 = vadd.f32 %v2309_v19, %v2250_v44  ;;  %v3055_v57 = vpop.f32.mrb[47].mxu0 }
0x132f   :  { %v2335_v28 = vmul.f32 %v2329_v13, %v2307_v41  ;;  %v2330_v34 = vmul.f32 %v2310_v11, %v2310_v11 }
0x1331   :  { %v2341_v6 = vmul.f32 0.044715, %v2335_v28  ;;  %v2336_v15 = vmul.f32 %v2330_v34, %v2310_v11 }
0x1333   :  { %v2347_v17 = vadd.f32 %v2341_v6, %v2307_v41  ;;  %v2342_v0 = vmul.f32 0.044715, %v2336_v15 }
0x1335   :  { %v2353_v47 = vmul.f32 0.7978846, %v2347_v17  ;;  %v2348_v51 = vadd.f32 %v2342_v0, %v2310_v11 }
0x1337   :  { %3378 = vtanh.f32 %v2353_v47  ;;  %v2354_v49 = vmul.f32 0.7978846, %v2348_v51 }
0x1339   :  { %3380 = vtanh.f32 %v2354_v49 }
0x1341   :  { %v3379_v14 = vpop.eup %3378 }
0x1342   :  { %v2365_v37 = vadd.f32 1.0, %v3379_v14 }
0x1343   :  { %v3381_v4 = vpop.eup %3380 }
0x1344   :  { %v2371_v8 = vmul.f32 0.5, %v2365_v37  ;;  %v2366_v22 = vadd.f32 1.0, %v3381_v4 }
0x1346   :  { %v2372_v38 = vmul.f32 0.5, %v2366_v22  ;;  %v2377_v16 = vmul.f32 %v2371_v8, %v2307_v41 }
0x1348   :  { %v2378_v45 = vmul.f32 %v2372_v38, %v2310_v11 }
0x134a   :  { %v2383_v26 = vpack.c.bf16 %v2378_v45, %v2377_v16 }
0x134c   :  { %3081 = vmatmul.mubr.bf16.vlgmr.msra.gmra.mrb[56].mxu1 %v2383_v26  ;;  %v3434_v26 = vmov 0.0|0.0  }
0x134d   :  { %3084 = vmatprep.mubr.msk.bf16.mxu1 %vm3418_vm1, %v3417_v43  ;;  %3115 = vmatprep.subr.bf16.mxu0 %v3434_v26 }
0x135f   :  { %v2314_v1 = vpop.f32.mrb[48].mxu0 }
0x1360   :  { %v2315_v36 = vadd.f32 %v2314_v1, %v2250_v44  ;;  %v3058_v7 = vpop.f32.mrb[49].mxu0  ;;  %v2405_v1 = vrot.slane %v4216_v12, %v335_v54 }
0x1361   :  { %v2317_v18 = vpop.f32.mrb[50].mxu0 }
0x1362   :  { %v2331_v25 = vmul.f32 %v2315_v36, %v2315_v36  ;;  %v2318_v3 = vadd.f32 %v2317_v18, %v2250_v44  ;;  %v3059_v9 = vpop.f32.mrb[51].mxu0 }
0x1364   :  { %v2337_v33 = vmul.f32 %v2331_v25, %v2315_v36  ;;  %v2332_v63 = vmul.f32 %v2318_v3, %v2318_v3 }
0x1366   :  { %v2343_v10 = vmul.f32 0.044715, %v2337_v33  ;;  %v2338_v52 = vmul.f32 %v2332_v63, %v2318_v3 }
0x1367   :  { %v2322_v29 = vpop.f32.mrb[52].mxu0 }
0x1368   :  { %v2349_v31 = vadd.f32 %v2343_v10, %v2315_v36  ;;  %v2344_v62 = vmul.f32 0.044715, %v2338_v52  ;;  %v2323_v2 = vadd.f32 %v2322_v29, %v2250_v44  ;;  %v3062_v50 = vpop.f32.mrb[53].mxu0 }
0x1369   :  { %v2325_v42 = vpop.f32.mrb[54].mxu0 }
0x136a   :  { %v2355_v32 = vmul.f32 0.7978846, %v2349_v31  ;;  %v2350_v24 = vadd.f32 %v2344_v62, %v2318_v3  ;;  %v2333_v53 = vmul.f32 %v2323_v2, %v2323_v2  ;;  %v2326_v46 = vadd.f32 %v2325_v42, %v2250_v44  ;;  %v3063_v5 = vpop.f32.mrb[55].mxu0 }
0x136c   :  { %3382 = vtanh.f32 %v2355_v32  ;;  %v2356_v48 = vmul.f32 0.7978846, %v2350_v24  ;;  %v2339_v20 = vmul.f32 %v2333_v53, %v2323_v2  ;;  %v2334_v21 = vmul.f32 %v2326_v46, %v2326_v46 }
0x136e   :  { %3384 = vtanh.f32 %v2356_v48  ;;  %v2345_v39 = vmul.f32 0.044715, %v2339_v20  ;;  %v2340_v41 = vmul.f32 %v2334_v21, %v2326_v46 }
0x1370   :  { %v2351_v30 = vadd.f32 %v2345_v39, %v2323_v2  ;;  %v2346_v19 = vmul.f32 0.044715, %v2340_v41 }
0x1372   :  { %v2357_v13 = vmul.f32 0.7978846, %v2351_v30  ;;  %v2352_v11 = vadd.f32 %v2346_v19, %v2326_v46 }
0x1374   :  { %3386 = vtanh.f32 %v2357_v13  ;;  %v2358_v57 = vmul.f32 0.7978846, %v2352_v11  ;;  %v3232_v11 = vld [vmem:[%s4325_s10] sm:$0xff]  }
0x1376   :  { %v3383_v28 = vpop.eup %3382  ;;  %3388 = vtanh.f32 %v2358_v57  ;;  %v3233_v57 = vld [vmem:[%s4325_s10 + $0x8] sm:$0xff]   ;;  %s3435_s10 = smov [#allocation2]  }
0x1377   :  { %v2367_v34 = vadd.f32 1.0, %v3383_v28  ;;  %s2687_s18 = sshll.u32 %s3435_s10, 4  ;;  %s2688_s18 = int_to_ptr.vmem [resolvable:$true] %s2687_s18 }
0x1378   :  { %v3385_v6 = vpop.eup %3384  ;;  %s3393_s19 = scalar_lea.vmem %s2688_s18, 32  ;;  %p3398_p1 = scmp.lt.s32.totalorder %s2688_s18, %s2688_s18 }
0x1379   :  { %v2368_v15 = vadd.f32 1.0, %v3385_v6  ;;  %v2373_v44 = vmul.f32 0.5, %v2367_v34  ;;  %p3394_p0 = scmp.ne.s32.totalorder %s2688_s18, %s3393_s19  ;;  %p3399_p2 = scmp.lt.s32.totalorder %s3393_s19, %s3393_s19 }
0x137b   :  { %v2374_v17 = vmul.f32 0.5, %v2368_v15  ;;  %v2379_v0 = vmul.f32 %v2373_v44, %v2315_v36  ;;  %v2609_v15 = vrot.slane %v4216_v12, %v345_v58  ;;  %p3400_p3 = por %p3399_p2, %p3398_p1 }
0x137d   :  { %v2380_v47 = vmul.f32 %v2374_v17, %v2318_v3  ;;  %p3401_p4 = pnand %p3400_p3, %p3394_p0 }
0x137e   :  { %v3387_v51 = vpop.eup %3386 }
0x137f   :  { %v2384_v49 = vpack.c.bf16 %v2380_v47, %v2379_v0  ;;  %v2369_v14 = vadd.f32 1.0, %v3387_v51  ;;  %v2614_v0 = vrot.slane %v4216_v12, %v487_v56 }
0x1380   :  { %v3389_v37 = vpop.eup %3388 }
0x1381   :  { %3085 = vmatmul.mubr.bf16.gmra.mrb[60].mxu1 %v2384_v49  ;;  %v2370_v4 = vadd.f32 1.0, %v3389_v37  ;;  %v2375_v8 = vmul.f32 0.5, %v2369_v14 }
0x1382   :  { %3088 = vmatprep.mubr.msk.bf16.mxu1 %vm3418_vm1, %v3417_v43 }
0x1383   :  { %v2376_v22 = vmul.f32 0.5, %v2370_v4  ;;  %v2381_v38 = vmul.f32 %v2375_v8, %v2323_v2 }
0x1385   :  { %v2382_v16 = vmul.f32 %v2376_v22, %v2326_v46 }
0x1387   :  { %v2385_v45 = vpack.c.bf16 %v2382_v16, %v2381_v38 }
0x1389   :  { %3089 = vmatmul.mubr.bf16.gmra.mrb[64].mxu1 %v2385_v45 }
0x141f   :  { %v2488_v36 = vpop.f32.mrb[56].mxu1 }
0x1420   :  { %v2489_v7 = vadd.f32 %v2488_v36, %v2405_v1  ;;  %v3082_v18 = vpop.f32.mrb[57].mxu1 }
0x1421   :  { %v2491_v25 = vpop.f32.mrb[58].mxu1 }
0x1422   :  { %v2492_v3 = vadd.f32 %v2491_v25, %v2405_v1  ;;  %v3083_v9 = vpop.f32.mrb[59].mxu1  ;;  %v2511_v33 = vadd.f32 %v2489_v7, %v4165_v60 }
0x1424   :  { %v2512_v63 = vadd.f32 %v2492_v3, %v4168_v55 }
0x1426   :  { %v3116_v10 = vpack.c.bf16 %v2512_v63, %v2511_v33 }
0x1428   :  { %3117 = vmatpush3.bf16.msra.mxu0 %v3116_v10 }
0x1429   :  { %3118 = vmatprep.subr.bf16.mxu0 %v3434_v26 }
0x1454   :  { %v2496_v52 = vpop.f32.mrb[60].mxu1 }
0x1455   :  { %v2497_v29 = vadd.f32 %v2496_v52, %v2405_v1  ;;  %v3086_v31 = vpop.f32.mrb[61].mxu1 }
0x1456   :  { %v2499_v62 = vpop.f32.mrb[62].mxu1 }
0x1457   :  { %v2500_v2 = vadd.f32 %v2499_v62, %v2405_v1  ;;  %v3087_v50 = vpop.f32.mrb[63].mxu1  ;;  %v2513_v54 = vadd.f32 %v2497_v29, %v4175_v27  ;;  %v2517_v27 = vld [vmem:[%s4319_s4] sm:$0x3] }
0x1459   :  { %v2514_v42 = vadd.f32 %v2500_v2, %v4178_v23 }
0x145b   :  { %v3119_v32 = vpack.c.bf16 %v2514_v42, %v2513_v54 }
0x145c   :  { %v2504_v24 = vpop.f32.mrb[64].mxu1 }
0x145d   :  { %v2505_v53 = vadd.f32 %v2504_v24, %v2405_v1  ;;  %v3090_v46 = vpop.f32.mrb[65].mxu1  ;;  %3120 = vmatpush3.bf16.msra.mxu0 %v3119_v32 }
0x145e   :  { %v2507_v60 = vpop.f32.mrb[66].mxu1  ;;  %3121 = vmatprep.subr.bf16.mxu0 %v3434_v26 }
0x145f   :  { %v2508_v55 = vadd.f32 %v2507_v60, %v2405_v1  ;;  %v3091_v5 = vpop.f32.mrb[67].mxu1  ;;  %v2515_v48 = vadd.f32 %v2505_v53, %v4185_v35 }
0x1461   :  { %v2516_v20 = vadd.f32 %v2508_v55, %v4188_v40 }
0x1463   :  { %v3122_v21 = vpack.c.bf16 %v2516_v20, %v2515_v48 }
0x1465   :  { %3123 = vmatpush3.bf16.msra.mxu0 %v3122_v21 }
0x1466   :  { %3107 = vmatprep.subr.bf16.mxu0 %v3417_v43 }
0x1468   :  { %3105 = vmatmul.mubr.msk.f32.vlgmr.msra.gmra.mrb[56].mxu0 %vm2518_vm8, %v2517_v27 }
0x1469   :  { %3111 = vmatprep.mubr.msk.bf16.mxu0 %vm3418_vm1, %v3417_v43  ;;  %3108 = vmatpush3.bf16.msra.mxu0 %v3232_v11 }
0x146a   :  { %3109 = vmatprep.subr.bf16.mxu0 %v3417_v43  ;;  %v2624_v43 = vrot.slane %v4216_v12, %v497_v61 }
0x146d   :  { %3110 = vmatpush3.bf16.msra.mxu0 %v3233_v57 }
0x153b   :  { %v2588_v23 = vpop.f32.mrb[56].mxu0 }
0x153c   :  { %v2593_v39 = vsel %vm2592_vm9, %v2588_v23, 0.0  ;;  %v3106_v41 = vpop.f32.mrb[57].mxu0 }
0x153d   :  { %2594 = vadd.xlane.f32.xlu1 %v2593_v39 }
0x15ca   :  { %v2595_v35 = vpop.xlane.xlu1 %2594 }
0x15cb   :  { %v2596_v40 = vmul.f32 0.03125, %v2595_v35 }
0x15cd   :  { %v2597_v30 = vsub.f32 %v2588_v23, %v2596_v40 }
0x15cf   :  { %v2598_v19 = vmul.f32 %v2597_v30, %v2597_v30 }
0x15d1   :  { %v2599_v13 = vsel %vm2592_vm9, %v2598_v19, 0.0 }
0x15d2   :  { %2600 = vadd.xlane.f32.xlu0 %v2599_v13 }
0x165f   :  { %v2601_v28 = vpop.xlane.xlu0 %2600 }
0x1660   :  { %v2602_v34 = vmul.f32 0.03125, %v2601_v28 }
0x1662   :  { %v2603_v6 = vadd.f32 1e-05, %v2602_v34 }
0x1664   :  { %3390 = vrsqrt.f32 %v2603_v6 }
0x166e   :  { %v3391_v44 = vpop.eup %3390 }
0x166f   :  { %v2605_v17 = vmul.f32 %v3391_v44, %v2597_v30 }
0x1671   :  { %v2610_v47 = vmul.f32 %v2609_v15, %v2605_v17 }
0x1673   :  { %v2615_v51 = vadd.f32 %v2614_v0, %v2610_v47 }
0x1675   :  { %v2616_v49 = vpack.c.bf16 %v2615_v51, %v2615_v51 }
0x1677   :  { %3112 = vmatmul.mubr.msk.bf16.vlgmr.msra.gmra.mrb[60].mxu0 %vm253_vm2, %v2616_v49 }
0x174a   :  { %v2674_v14 = vpop.f32.mrb[60].mxu0 }
0x174b   :  { %v2675_v37 = vadd.f32 %v2674_v14, %v2624_v43  ;;  %v3113_v58 = vpop.f32.mrb[61].mxu0 }
0x174c   :  { %v2677_v4 = vpop.f32.mrb[62].mxu0 }
0x174d   :  { %2680 = vst [vmem:[#allocation2] sm:$0x3] %v2675_v37  ;;  %v3114_v8 = vpop.f32.mrb[63].mxu0 }
0x174e   :  { %3404 = shalt.err (!%p3401_p4)
}
0x174f   :  { %s3405_s21 = scalar_lea.hbm %s4326_s11, 32 }
0x1750   :  { %p3406_p5 = scmp.ne.s32.totalorder %s4326_s11, %s3405_s21  ;;  %p3409_p6 = scmp.lt.u32.totalorder %s3405_s21, %s4326_s11 }
0x1752   :  { %p3411_p7 = pnand %p3409_p6, %p3406_p5 }
0x1754   :  { %3414 = shalt.err (!%p3411_p7)
}
0x1755   :  { %2690 = dma.vmem_to_hbm [thread:$0]  %s2688_s18, 32, %s4326_s11, [#allocation3]  }
0x1756   :  { %3415 = dma.done.wait [#allocation3], 32  }
0x1757   :  { %3416 = vsyncadd [#allocation3], 4294967264 }
0x1758   :  { %2694 = vsyncpa [#allocation3], 1 }

</bundles_post_ra>
